<compile_context>
chip_gen: v7x
topology: tpu7x:2x2x1
jax: 0.10.0
libtpu: 0.0.40
codegen_flags: <defaults>
</compile_context>

<pallas_src>
import functools

import jax
import jax.numpy as jnp
from jax.experimental import pallas as pl
from jax.experimental.pallas import tpu as pltpu


def _round_up(x, m):
    return (x + m - 1) // m * m


def _nerv_block_kernel(x_prev_ref, x_cur_ref, x_next_ref, w_ref, b_ref,
                       o_ref, xcol_ref, *, cin, h, w, wp, l_pan, l_out,
                       neg_slope):
    # x_*_ref:  (Cin, Mpl)      bf16  flat-halo-padded planes d, d+1, d+2
    # w_ref:    (Cout, 27*Cin)  bf16  conv weight, K ordered tap-major/cin-minor
    # b_ref:    (Cout, 1)       f32   bias
    # o_ref:    (Cout, Lout)    bf16  conv output at the H*W *valid* positions
    # xcol_ref: (27*Cin, Lpan)  bf16  VMEM im2col panel (scratch)
    planes = (x_prev_ref, x_cur_ref, x_next_ref)
    taps = [(planes[kd], kh * wp + kw)
            for kd in range(3) for kh in range(3) for kw in range(3)]

    # Build the bf16 im2col panel from 27 static, contiguous lane slices.
    # Two taps per store: 2*Cin = 16 sublanes = one packed bf16 vreg height.
    for j in range(len(taps) // 2):
        (r0, o0), (r1, o1) = taps[2 * j], taps[2 * j + 1]
        xcol_ref[2 * j * cin:(2 * j + 2) * cin, :] = jnp.concatenate(
            [r0[:, o0:o0 + l_pan], r1[:, o1:o1 + l_pan]], axis=0)
    r_last, o_last = taps[-1]
    xcol_ref[(len(taps) - 1) * cin:, :] = r_last[:, o_last:o_last + l_pan]

    # Single MXU matmul, K = 27*Cin, bf16 operands, f32 accumulation.
    acc = jnp.dot(w_ref[...], xcol_ref[...], preferred_element_type=jnp.float32)
    res = acc + b_ref[...]
    res = jnp.maximum(res, neg_slope * res)        # LeakyReLU(0.01), f32

    # Fused interior crop: keep only the valid (h, w) positions of the padded
    # plane; border lanes (which saw flat-index 'wrap' reads) are dropped here.
    for hh in range(h):
        src = (hh + 1) * wp + 1
        o_ref[:, hh * w:(hh + 1) * w] = res[:, src:src + w].astype(o_ref.dtype)
    if l_out > h * w:
        o_ref[:, h * w:] = jnp.zeros((o_ref.shape[0], l_out - h * w),
                                     o_ref.dtype)


def quant_nerv_block3d(x, weight, bias, *, scale, neg_slope=0.01,
                       out_dtype=jnp.bfloat16):
    """x: (N, Cin, D, H, W).  weight: (Cout, Cin, 3, 3, 3).  bias: (Cout,)."""
    N, Cin, D, H, W = x.shape
    Cout = weight.shape[0]
    assert Cout % (scale ** 3) == 0
    Dp, Hp, Wp = D + 2, H + 2, W + 2
    S2 = Wp + 1                              # max backward tap reach within a plane
    Lpan = _round_up(Hp * Wp, 128)           # matmul lane width (padded plane)
    Mpl = _round_up(Lpan + 2 * S2, 128)      # flat-halo-padded plane width
    Lout = _round_up(H * W, 128)             # lane width of the cropped output

    # Zero-pad D/H/W by 1 (the conv's own padding), put depth ahead of
    # channels, flatten each padded plane, and give it a flat halo of S2 zeros
    # on the left so tap (kh, kw) at plane position p is flat index
    # p + kh*Wp + kw of this array (a static contiguous lane slice).
    xp = jnp.pad(x, ((0, 0), (0, 0), (1, 1), (1, 1), (1, 1)))
    xp = xp.transpose(0, 2, 1, 3, 4).reshape(N, Dp, Cin, Hp * Wp)
    xp = jnp.pad(xp, ((0, 0), (0, 0), (0, 0), (S2, Mpl - Hp * Wp - S2)))
    xp = xp.astype(jnp.bfloat16)

    # (Cout, Cin, 3,3,3) -> (Cout, 27*Cin); K index = (kd*9 + kh*3 + kw)*Cin + cin.
    w2 = jnp.transpose(weight, (0, 2, 3, 4, 1)).reshape(Cout, 27 * Cin)
    w2 = w2.astype(jnp.bfloat16)
    b2 = bias.reshape(Cout, 1).astype(jnp.float32)

    kernel = functools.partial(_nerv_block_kernel, cin=Cin, h=H, w=W, wp=Wp,
                               l_pan=Lpan, l_out=Lout, neg_slope=neg_slope)

    out = pl.pallas_call(
        kernel,
        out_shape=jax.ShapeDtypeStruct((N, D, Cout, Lout), out_dtype),
        grid_spec=pltpu.PrefetchScalarGridSpec(
            num_scalar_prefetch=0,
            grid=(N, D),
            in_specs=[
                # padded depth planes d, d+1, d+2 for output depth d
                pl.BlockSpec((None, None, Cin, Mpl), lambda n, d: (n, d, 0, 0)),
                pl.BlockSpec((None, None, Cin, Mpl), lambda n, d: (n, d + 1, 0, 0)),
                pl.BlockSpec((None, None, Cin, Mpl), lambda n, d: (n, d + 2, 0, 0)),
                pl.BlockSpec((Cout, 27 * Cin), lambda n, d: (0, 0)),
                pl.BlockSpec((Cout, 1), lambda n, d: (0, 0)),
            ],
            out_specs=pl.BlockSpec((None, None, Cout, Lout),
                                   lambda n, d: (n, d, 0, 0)),
            scratch_shapes=[pltpu.VMEM((27 * Cin, Lpan), jnp.bfloat16)],
        ),
        compiler_params=pltpu.CompilerParams(
            dimension_semantics=("parallel", "parallel"),
            vmem_limit_bytes=32 * 1024 * 1024),
    )(xp, xp, xp, w2, b2)

    # PixelShuffle3D(scale): with the kernel's (N, D, Cout=(c,sd,sh,sw), H*W)
    # layout this is a single transpose of the minimal, valid-only bf16 tensor;
    # the final reshape merges adjacent dims (no extra copy).
    s = scale
    new_c = Cout // (s ** 3)
    out = out[..., :H * W].reshape(N, D, new_c, s, s, s, H, W)
    out = out.transpose(0, 2, 1, 3, 6, 4, 7, 5)    # (n, c, d, sd, h, sh, w, sw)
    out = out.reshape(N, new_c, D * s, H * s, W * s)
    return out


def _reference(x, weight, bias, *, scale, neg_slope=0.01):
    """Pure-JAX f32 reference mirroring the PyTorch forward exactly."""
    conv = jax.lax.conv_general_dilated(
        x, weight, window_strides=(1, 1, 1),
        padding=((1, 1), (1, 1), (1, 1)),
        dimension_numbers=("NCDHW", "OIDHW", "NCDHW"))
    conv = conv + bias[None, :, None, None, None]
    N, C, D, H, W = conv.shape
    s = scale
    ps = conv.reshape(N, C // s ** 3, s, s, s, D, H, W)
    ps = ps.transpose(0, 1, 5, 2, 6, 3, 7, 4)
    ps = ps.reshape(N, C // s ** 3, D * s, H * s, W * s)
    return jnp.where(ps > 0, ps, neg_slope * ps)


if __name__ == "__main__":
    # Module config: QuantNeRVBlock3D(in_channel=8, out_channel=8, scale=2,
    #                                 bias=True, act='leaky', conv_type='conv',
    #                                 num_bits=8)
    in_channel, out_channel, scale = 8, 8, 2
    N, D, H, W = 2, 4, 8, 8
    cout_conv = out_channel * scale ** 3      # conv emits out_channel * s^3 channels

    key = jax.random.PRNGKey(0)
    kx, kw, kb = jax.random.split(key, 3)

    # Conv3d default init: uniform(-1/sqrt(fan_in), 1/sqrt(fan_in)).
    fan_in = in_channel * 3 * 3 * 3
    bound = 1.0 / (fan_in ** 0.5)
    weight = jax.random.uniform(kw, (cout_conv, in_channel, 3, 3, 3),
                                jnp.float32, -bound, bound)
    bias = jax.random.uniform(kb, (cout_conv,), jnp.float32, -bound, bound)
    x = jax.random.normal(kx, (N, in_channel, D, H, W), jnp.float32)

    out = quant_nerv_block3d(x, weight, bias, scale=scale)
    out = jax.block_until_ready(out)

    ref = _reference(x, weight, bias, scale=scale)
    assert out.shape == (N, out_channel, D * scale, H * scale, W * scale), out.shape
    # bf16 matmul operands + bf16 activations/output vs f32 reference.
    err = float(jnp.max(jnp.abs(out.astype(jnp.float32) - ref)))
    assert err < 3e-2, f"max abs err {err}"

    print("KERNEL_OK")
</pallas_src>

<mosaic_0001>
module attributes {stable_mosaic.version = 11 : i64} {
  func.func @_nerv_block_kernel(%arg0: i32, %arg1: i32, %arg2: memref<1x1x8x256xbf16, #tpu.memory_space<vmem>>, %arg3: memref<1x1x8x256xbf16, #tpu.memory_space<vmem>>, %arg4: memref<1x1x8x256xbf16, #tpu.memory_space<vmem>>, %arg5: memref<64x216xbf16, #tpu.memory_space<vmem>>, %arg6: memref<64x1xf32, #tpu.memory_space<vmem>>, %arg7: memref<1x1x64x128xbf16, #tpu.memory_space<vmem>>, %arg8: memref<216x128xbf16, #tpu.memory_space<vmem>>) attributes {dimension_semantics = [#tpu.dimension_semantics<parallel>, #tpu.dimension_semantics<parallel>], iteration_bounds = array<i64: 2, 4>, scalar_prefetch = 0 : i64, scratch_operands = 1 : i64, tpu.core_type = #tpu.core_type<tc>, window_params = [{transform_indices = @transform_0, window_bounds = array<i64: 1, 1, 8, 256>}, {transform_indices = @transform_1, window_bounds = array<i64: 1, 1, 8, 256>}, {transform_indices = @transform_2, window_bounds = array<i64: 1, 1, 8, 256>}, {pipeline_mode = #tpu.pipeline_mode<synchronous>, transform_indices = @transform_3, window_bounds = array<i64: 64, 216>}, {pipeline_mode = #tpu.pipeline_mode<synchronous>, transform_indices = @transform_4, window_bounds = array<i64: 64, 1>}, {transform_indices = @transform_5, window_bounds = array<i64: 1, 1, 64, 128>}]} {
    %c0 = arith.constant 0 : index
    %c0_0 = arith.constant 0 : index
    %c0_1 = arith.constant 0 : index
    %c0_2 = arith.constant 0 : index
    %0 = vector.load %arg2[%c0, %c0_0, %c0_1, %c0_2] : memref<1x1x8x256xbf16, #tpu.memory_space<vmem>>, vector<1x1x8x128xbf16>
    %1 = vector.shape_cast %0 : vector<1x1x8x128xbf16> to vector<8x128xbf16>
    %c0_3 = arith.constant 0 : index
    %c0_4 = arith.constant 0 : index
    %c0_5 = arith.constant 0 : index
    %c1 = arith.constant 1 : index
    %2 = vector.load %arg2[%c0_3, %c0_4, %c0_5, %c1] : memref<1x1x8x256xbf16, #tpu.memory_space<vmem>>, vector<1x1x8x128xbf16>
    %3 = vector.shape_cast %2 : vector<1x1x8x128xbf16> to vector<8x128xbf16>
    %4 = tpu.concatenate %1, %3 in 0 : vector<8x128xbf16>, vector<8x128xbf16> -> vector<16x128xbf16>
    %c0_6 = arith.constant 0 : index
    %c0_7 = arith.constant 0 : index
    %5 = vector.load %arg8[%c0_6, %c0_7] : memref<216x128xbf16, #tpu.memory_space<vmem>>, vector<16x128xbf16>
    tpu.vector_store %arg8[%c0_6, %c0_7], %4 {strides = array<i32>} : memref<216x128xbf16, #tpu.memory_space<vmem>>, vector<16x128xbf16>,
    %c0_8 = arith.constant 0 : index
    %c0_9 = arith.constant 0 : index
    %c0_10 = arith.constant 0 : index
    %c2 = arith.constant 2 : index
    %6 = vector.load %arg2[%c0_8, %c0_9, %c0_10, %c2] : memref<1x1x8x256xbf16, #tpu.memory_space<vmem>>, vector<1x1x8x128xbf16>
    %7 = vector.shape_cast %6 : vector<1x1x8x128xbf16> to vector<8x128xbf16>
    %c0_11 = arith.constant 0 : index
    %c0_12 = arith.constant 0 : index
    %c0_13 = arith.constant 0 : index
    %c10 = arith.constant 10 : index
    %8 = vector.load %arg2[%c0_11, %c0_12, %c0_13, %c10] : memref<1x1x8x256xbf16, #tpu.memory_space<vmem>>, vector<1x1x8x128xbf16>
    %9 = vector.shape_cast %8 : vector<1x1x8x128xbf16> to vector<8x128xbf16>
    %10 = tpu.concatenate %7, %9 in 0 : vector<8x128xbf16>, vector<8x128xbf16> -> vector<16x128xbf16>
    %c16 = arith.constant 16 : index
    %c0_14 = arith.constant 0 : index
    %11 = vector.load %arg8[%c16, %c0_14] : memref<216x128xbf16, #tpu.memory_space<vmem>>, vector<16x128xbf16>
    tpu.vector_store %arg8[%c16, %c0_14], %10 {strides = array<i32>} : memref<216x128xbf16, #tpu.memory_space<vmem>>, vector<16x128xbf16>,
    %c0_15 = arith.constant 0 : index
    %c0_16 = arith.constant 0 : index
    %c0_17 = arith.constant 0 : index
    %c11 = arith.constant 11 : index
    %12 = vector.load %arg2[%c0_15, %c0_16, %c0_17, %c11] : memref<1x1x8x256xbf16, #tpu.memory_space<vmem>>, vector<1x1x8x128xbf16>
    %13 = vector.shape_cast %12 : vector<1x1x8x128xbf16> to vector<8x128xbf16>
    %c0_18 = arith.constant 0 : index
    %c0_19 = arith.constant 0 : index
    %c0_20 = arith.constant 0 : index
    %c12 = arith.constant 12 : index
    %14 = vector.load %arg2[%c0_18, %c0_19, %c0_20, %c12] : memref<1x1x8x256xbf16, #tpu.memory_space<vmem>>, vector<1x1x8x128xbf16>
    %15 = vector.shape_cast %14 : vector<1x1x8x128xbf16> to vector<8x128xbf16>
    %16 = tpu.concatenate %13, %15 in 0 : vector<8x128xbf16>, vector<8x128xbf16> -> vector<16x128xbf16>
    %c32 = arith.constant 32 : index
    %c0_21 = arith.constant 0 : index
    %17 = vector.load %arg8[%c32, %c0_21] : memref<216x128xbf16, #tpu.memory_space<vmem>>, vector<16x128xbf16>
    tpu.vector_store %arg8[%c32, %c0_21], %16 {strides = array<i32>} : memref<216x128xbf16, #tpu.memory_space<vmem>>, vector<16x128xbf16>,
    %c0_22 = arith.constant 0 : index
    %c0_23 = arith.constant 0 : index
    %c0_24 = arith.constant 0 : index
    %c20 = arith.constant 20 : index
    %18 = vector.load %arg2[%c0_22, %c0_23, %c0_24, %c20] : memref<1x1x8x256xbf16, #tpu.memory_space<vmem>>, vector<1x1x8x128xbf16>
    %19 = vector.shape_cast %18 : vector<1x1x8x128xbf16> to vector<8x128xbf16>
    %c0_25 = arith.constant 0 : index
    %c0_26 = arith.constant 0 : index
    %c0_27 = arith.constant 0 : index
    %c21 = arith.constant 21 : index
    %20 = vector.load %arg2[%c0_25, %c0_26, %c0_27, %c21] : memref<1x1x8x256xbf16, #tpu.memory_space<vmem>>, vector<1x1x8x128xbf16>
    %21 = vector.shape_cast %20 : vector<1x1x8x128xbf16> to vector<8x128xbf16>
    %22 = tpu.concatenate %19, %21 in 0 : vector<8x128xbf16>, vector<8x128xbf16> -> vector<16x128xbf16>
    %c48 = arith.constant 48 : index
    %c0_28 = arith.constant 0 : index
    %23 = vector.load %arg8[%c48, %c0_28] : memref<216x128xbf16, #tpu.memory_space<vmem>>, vector<16x128xbf16>
    tpu.vector_store %arg8[%c48, %c0_28], %22 {strides = array<i32>} : memref<216x128xbf16, #tpu.memory_space<vmem>>, vector<16x128xbf16>,
    %c0_29 = arith.constant 0 : index
    %c0_30 = arith.constant 0 : index
    %c0_31 = arith.constant 0 : index
    %c22 = arith.constant 22 : index
    %24 = vector.load %arg2[%c0_29, %c0_30, %c0_31, %c22] : memref<1x1x8x256xbf16, #tpu.memory_space<vmem>>, vector<1x1x8x128xbf16>
    %25 = vector.shape_cast %24 : vector<1x1x8x128xbf16> to vector<8x128xbf16>
    %c0_32 = arith.constant 0 : index
    %c0_33 = arith.constant 0 : index
    %c0_34 = arith.constant 0 : index
    %c0_35 = arith.constant 0 : index
    %26 = vector.load %arg3[%c0_32, %c0_33, %c0_34, %c0_35] : memref<1x1x8x256xbf16, #tpu.memory_space<vmem>>, vector<1x1x8x128xbf16>
    %27 = vector.shape_cast %26 : vector<1x1x8x128xbf16> to vector<8x128xbf16>
    %28 = tpu.concatenate %25, %27 in 0 : vector<8x128xbf16>, vector<8x128xbf16> -> vector<16x128xbf16>
    %c64 = arith.constant 64 : index
    %c0_36 = arith.constant 0 : index
    %29 = vector.load %arg8[%c64, %c0_36] : memref<216x128xbf16, #tpu.memory_space<vmem>>, vector<16x128xbf16>
    tpu.vector_store %arg8[%c64, %c0_36], %28 {strides = array<i32>} : memref<216x128xbf16, #tpu.memory_space<vmem>>, vector<16x128xbf16>,
    %c0_37 = arith.constant 0 : index
    %c0_38 = arith.constant 0 : index
    %c0_39 = arith.constant 0 : index
    %c1_40 = arith.constant 1 : index
    %30 = vector.load %arg3[%c0_37, %c0_38, %c0_39, %c1_40] : memref<1x1x8x256xbf16, #tpu.memory_space<vmem>>, vector<1x1x8x128xbf16>
    %31 = vector.shape_cast %30 : vector<1x1x8x128xbf16> to vector<8x128xbf16>
    %c0_41 = arith.constant 0 : index
    %c0_42 = arith.constant 0 : index
    %c0_43 = arith.constant 0 : index
    %c2_44 = arith.constant 2 : index
    %32 = vector.load %arg3[%c0_41, %c0_42, %c0_43, %c2_44] : memref<1x1x8x256xbf16, #tpu.memory_space<vmem>>, vector<1x1x8x128xbf16>
    %33 = vector.shape_cast %32 : vector<1x1x8x128xbf16> to vector<8x128xbf16>
    %34 = tpu.concatenate %31, %33 in 0 : vector<8x128xbf16>, vector<8x128xbf16> -> vector<16x128xbf16>
    %c80 = arith.constant 80 : index
    %c0_45 = arith.constant 0 : index
    %35 = vector.load %arg8[%c80, %c0_45] : memref<216x128xbf16, #tpu.memory_space<vmem>>, vector<16x128xbf16>
    tpu.vector_store %arg8[%c80, %c0_45], %34 {strides = array<i32>} : memref<216x128xbf16, #tpu.memory_space<vmem>>, vector<16x128xbf16>,
    %c0_46 = arith.constant 0 : index
    %c0_47 = arith.constant 0 : index
    %c0_48 = arith.constant 0 : index
    %c10_49 = arith.constant 10 : index
    %36 = vector.load %arg3[%c0_46, %c0_47, %c0_48, %c10_49] : memref<1x1x8x256xbf16, #tpu.memory_space<vmem>>, vector<1x1x8x128xbf16>
    %37 = vector.shape_cast %36 : vector<1x1x8x128xbf16> to vector<8x128xbf16>
    %c0_50 = arith.constant 0 : index
    %c0_51 = arith.constant 0 : index
    %c0_52 = arith.constant 0 : index
    %c11_53 = arith.constant 11 : index
    %38 = vector.load %arg3[%c0_50, %c0_51, %c0_52, %c11_53] : memref<1x1x8x256xbf16, #tpu.memory_space<vmem>>, vector<1x1x8x128xbf16>
    %39 = vector.shape_cast %38 : vector<1x1x8x128xbf16> to vector<8x128xbf16>
    %40 = tpu.concatenate %37, %39 in 0 : vector<8x128xbf16>, vector<8x128xbf16> -> vector<16x128xbf16>
    %c96 = arith.constant 96 : index
    %c0_54 = arith.constant 0 : index
    %41 = vector.load %arg8[%c96, %c0_54] : memref<216x128xbf16, #tpu.memory_space<vmem>>, vector<16x128xbf16>
    tpu.vector_store %arg8[%c96, %c0_54], %40 {strides = array<i32>} : memref<216x128xbf16, #tpu.memory_space<vmem>>, vector<16x128xbf16>,
    %c0_55 = arith.constant 0 : index
    %c0_56 = arith.constant 0 : index
    %c0_57 = arith.constant 0 : index
    %c12_58 = arith.constant 12 : index
    %42 = vector.load %arg3[%c0_55, %c0_56, %c0_57, %c12_58] : memref<1x1x8x256xbf16, #tpu.memory_space<vmem>>, vector<1x1x8x128xbf16>
    %43 = vector.shape_cast %42 : vector<1x1x8x128xbf16> to vector<8x128xbf16>
    %c0_59 = arith.constant 0 : index
    %c0_60 = arith.constant 0 : index
    %c0_61 = arith.constant 0 : index
    %c20_62 = arith.constant 20 : index
    %44 = vector.load %arg3[%c0_59, %c0_60, %c0_61, %c20_62] : memref<1x1x8x256xbf16, #tpu.memory_space<vmem>>, vector<1x1x8x128xbf16>
    %45 = vector.shape_cast %44 : vector<1x1x8x128xbf16> to vector<8x128xbf16>
    %46 = tpu.concatenate %43, %45 in 0 : vector<8x128xbf16>, vector<8x128xbf16> -> vector<16x128xbf16>
    %c112 = arith.constant 112 : index
    %c0_63 = arith.constant 0 : index
    %47 = vector.load %arg8[%c112, %c0_63] : memref<216x128xbf16, #tpu.memory_space<vmem>>, vector<16x128xbf16>
    tpu.vector_store %arg8[%c112, %c0_63], %46 {strides = array<i32>} : memref<216x128xbf16, #tpu.memory_space<vmem>>, vector<16x128xbf16>,
    %c0_64 = arith.constant 0 : index
    %c0_65 = arith.constant 0 : index
    %c0_66 = arith.constant 0 : index
    %c21_67 = arith.constant 21 : index
    %48 = vector.load %arg3[%c0_64, %c0_65, %c0_66, %c21_67] : memref<1x1x8x256xbf16, #tpu.memory_space<vmem>>, vector<1x1x8x128xbf16>
    %49 = vector.shape_cast %48 : vector<1x1x8x128xbf16> to vector<8x128xbf16>
    %c0_68 = arith.constant 0 : index
    %c0_69 = arith.constant 0 : index
    %c0_70 = arith.constant 0 : index
    %c22_71 = arith.constant 22 : index
    %50 = vector.load %arg3[%c0_68, %c0_69, %c0_70, %c22_71] : memref<1x1x8x256xbf16, #tpu.memory_space<vmem>>, vector<1x1x8x128xbf16>
    %51 = vector.shape_cast %50 : vector<1x1x8x128xbf16> to vector<8x128xbf16>
    %52 = tpu.concatenate %49, %51 in 0 : vector<8x128xbf16>, vector<8x128xbf16> -> vector<16x128xbf16>
    %c128 = arith.constant 128 : index
    %c0_72 = arith.constant 0 : index
    %53 = vector.load %arg8[%c128, %c0_72] : memref<216x128xbf16, #tpu.memory_space<vmem>>, vector<16x128xbf16>
    tpu.vector_store %arg8[%c128, %c0_72], %52 {strides = array<i32>} : memref<216x128xbf16, #tpu.memory_space<vmem>>, vector<16x128xbf16>,
    %c0_73 = arith.constant 0 : index
    %c0_74 = arith.constant 0 : index
    %c0_75 = arith.constant 0 : index
    %c0_76 = arith.constant 0 : index
    %54 = vector.load %arg4[%c0_73, %c0_74, %c0_75, %c0_76] : memref<1x1x8x256xbf16, #tpu.memory_space<vmem>>, vector<1x1x8x128xbf16>
    %55 = vector.shape_cast %54 : vector<1x1x8x128xbf16> to vector<8x128xbf16>
    %c0_77 = arith.constant 0 : index
    %c0_78 = arith.constant 0 : index
    %c0_79 = arith.constant 0 : index
    %c1_80 = arith.constant 1 : index
    %56 = vector.load %arg4[%c0_77, %c0_78, %c0_79, %c1_80] : memref<1x1x8x256xbf16, #tpu.memory_space<vmem>>, vector<1x1x8x128xbf16>
    %57 = vector.shape_cast %56 : vector<1x1x8x128xbf16> to vector<8x128xbf16>
    %58 = tpu.concatenate %55, %57 in 0 : vector<8x128xbf16>, vector<8x128xbf16> -> vector<16x128xbf16>
    %c144 = arith.constant 144 : index
    %c0_81 = arith.constant 0 : index
    %59 = vector.load %arg8[%c144, %c0_81] : memref<216x128xbf16, #tpu.memory_space<vmem>>, vector<16x128xbf16>
    tpu.vector_store %arg8[%c144, %c0_81], %58 {strides = array<i32>} : memref<216x128xbf16, #tpu.memory_space<vmem>>, vector<16x128xbf16>,
    %c0_82 = arith.constant 0 : index
    %c0_83 = arith.constant 0 : index
    %c0_84 = arith.constant 0 : index
    %c2_85 = arith.constant 2 : index
    %60 = vector.load %arg4[%c0_82, %c0_83, %c0_84, %c2_85] : memref<1x1x8x256xbf16, #tpu.memory_space<vmem>>, vector<1x1x8x128xbf16>
    %61 = vector.shape_cast %60 : vector<1x1x8x128xbf16> to vector<8x128xbf16>
    %c0_86 = arith.constant 0 : index
    %c0_87 = arith.constant 0 : index
    %c0_88 = arith.constant 0 : index
    %c10_89 = arith.constant 10 : index
    %62 = vector.load %arg4[%c0_86, %c0_87, %c0_88, %c10_89] : memref<1x1x8x256xbf16, #tpu.memory_space<vmem>>, vector<1x1x8x128xbf16>
    %63 = vector.shape_cast %62 : vector<1x1x8x128xbf16> to vector<8x128xbf16>
    %64 = tpu.concatenate %61, %63 in 0 : vector<8x128xbf16>, vector<8x128xbf16> -> vector<16x128xbf16>
    %c160 = arith.constant 160 : index
    %c0_90 = arith.constant 0 : index
    %65 = vector.load %arg8[%c160, %c0_90] : memref<216x128xbf16, #tpu.memory_space<vmem>>, vector<16x128xbf16>
    tpu.vector_store %arg8[%c160, %c0_90], %64 {strides = array<i32>} : memref<216x128xbf16, #tpu.memory_space<vmem>>, vector<16x128xbf16>,
    %c0_91 = arith.constant 0 : index
    %c0_92 = arith.constant 0 : index
    %c0_93 = arith.constant 0 : index
    %c11_94 = arith.constant 11 : index
    %66 = vector.load %arg4[%c0_91, %c0_92, %c0_93, %c11_94] : memref<1x1x8x256xbf16, #tpu.memory_space<vmem>>, vector<1x1x8x128xbf16>
    %67 = vector.shape_cast %66 : vector<1x1x8x128xbf16> to vector<8x128xbf16>
    %c0_95 = arith.constant 0 : index
    %c0_96 = arith.constant 0 : index
    %c0_97 = arith.constant 0 : index
    %c12_98 = arith.constant 12 : index
    %68 = vector.load %arg4[%c0_95, %c0_96, %c0_97, %c12_98] : memref<1x1x8x256xbf16, #tpu.memory_space<vmem>>, vector<1x1x8x128xbf16>
    %69 = vector.shape_cast %68 : vector<1x1x8x128xbf16> to vector<8x128xbf16>
    %70 = tpu.concatenate %67, %69 in 0 : vector<8x128xbf16>, vector<8x128xbf16> -> vector<16x128xbf16>
    %c176 = arith.constant 176 : index
    %c0_99 = arith.constant 0 : index
    %71 = vector.load %arg8[%c176, %c0_99] : memref<216x128xbf16, #tpu.memory_space<vmem>>, vector<16x128xbf16>
    tpu.vector_store %arg8[%c176, %c0_99], %70 {strides = array<i32>} : memref<216x128xbf16, #tpu.memory_space<vmem>>, vector<16x128xbf16>,
    %c0_100 = arith.constant 0 : index
    %c0_101 = arith.constant 0 : index
    %c0_102 = arith.constant 0 : index
    %c20_103 = arith.constant 20 : index
    %72 = vector.load %arg4[%c0_100, %c0_101, %c0_102, %c20_103] : memref<1x1x8x256xbf16, #tpu.memory_space<vmem>>, vector<1x1x8x128xbf16>
    %73 = vector.shape_cast %72 : vector<1x1x8x128xbf16> to vector<8x128xbf16>
    %c0_104 = arith.constant 0 : index
    %c0_105 = arith.constant 0 : index
    %c0_106 = arith.constant 0 : index
    %c21_107 = arith.constant 21 : index
    %74 = vector.load %arg4[%c0_104, %c0_105, %c0_106, %c21_107] : memref<1x1x8x256xbf16, #tpu.memory_space<vmem>>, vector<1x1x8x128xbf16>
    %75 = vector.shape_cast %74 : vector<1x1x8x128xbf16> to vector<8x128xbf16>
    %76 = tpu.concatenate %73, %75 in 0 : vector<8x128xbf16>, vector<8x128xbf16> -> vector<16x128xbf16>
    %c192 = arith.constant 192 : index
    %c0_108 = arith.constant 0 : index
    %77 = vector.load %arg8[%c192, %c0_108] : memref<216x128xbf16, #tpu.memory_space<vmem>>, vector<16x128xbf16>
    tpu.vector_store %arg8[%c192, %c0_108], %76 {strides = array<i32>} : memref<216x128xbf16, #tpu.memory_space<vmem>>, vector<16x128xbf16>,
    %c0_109 = arith.constant 0 : index
    %c0_110 = arith.constant 0 : index
    %c0_111 = arith.constant 0 : index
    %c22_112 = arith.constant 22 : index
    %78 = vector.load %arg4[%c0_109, %c0_110, %c0_111, %c22_112] : memref<1x1x8x256xbf16, #tpu.memory_space<vmem>>, vector<1x1x8x128xbf16>
    %79 = vector.shape_cast %78 : vector<1x1x8x128xbf16> to vector<8x128xbf16>
    %c208 = arith.constant 208 : index
    %c0_113 = arith.constant 0 : index
    %80 = vector.load %arg8[%c208, %c0_113] : memref<216x128xbf16, #tpu.memory_space<vmem>>, vector<8x128xbf16>
    tpu.vector_store %arg8[%c208, %c0_113], %79 {strides = array<i32>} : memref<216x128xbf16, #tpu.memory_space<vmem>>, vector<8x128xbf16>,
    %c0_114 = arith.constant 0 : index
    %c0_115 = arith.constant 0 : index
    %81 = vector.load %arg5[%c0_114, %c0_115] : memref<64x216xbf16, #tpu.memory_space<vmem>>, vector<64x216xbf16>
    %c0_116 = arith.constant 0 : index
    %c0_117 = arith.constant 0 : index
    %82 = vector.load %arg8[%c0_116, %c0_117] : memref<216x128xbf16, #tpu.memory_space<vmem>>, vector<216x128xbf16>
    %cst = arith.constant dense<0.000000e+00> : vector<64x128xf32>
    %83 = tpu.matmul %81, %82, %cst {dimension_numbers = #tpu.dot_dimension_numbers<[1], [0], [0], [1], [0, 0, 1, 1], [], []>} : vector<64x216xbf16>, vector<216x128xbf16>, vector<64x128xf32> -> vector<64x128xf32>
    %c0_118 = arith.constant 0 : index
    %c0_119 = arith.constant 0 : index
    %84 = vector.load %arg6[%c0_118, %c0_119] : memref<64x1xf32, #tpu.memory_space<vmem>>, vector<64x1xf32>
    %85 = vector.broadcast %84 : vector<64x1xf32> to vector<64x128xf32>
    %86 = arith.addf %83, %85 : vector<64x128xf32>
    %cst_120 = arith.constant 0.00999999977 : f32
    %87 = vector.broadcast %cst_120 : f32 to vector<64x128xf32>
    %88 = arith.mulf %87, %86 : vector<64x128xf32>
    %89 = arith.maximumf %86, %88 : vector<64x128xf32>
    %90 = vector.extract_strided_slice %89 {offsets = [0, 11], sizes = [64, 8], strides = [1, 1]} : vector<64x128xf32> to vector<64x8xf32>
    %91 = arith.truncf %90 : vector<64x8xf32> to vector<64x8xbf16>
    %c0_121 = arith.constant 0 : index
    %c0_122 = arith.constant 0 : index
    %c0_123 = arith.constant 0 : index
    %c0_124 = arith.constant 0 : index
    %92 = vector.load %arg7[%c0_121, %c0_122, %c0_123, %c0_124] : memref<1x1x64x128xbf16, #tpu.memory_space<vmem>>, vector<1x1x64x8xbf16>
    %93 = vector.shape_cast %92 : vector<1x1x64x8xbf16> to vector<64x8xbf16>
    %94 = vector.shape_cast %91 : vector<64x8xbf16> to vector<1x1x64x8xbf16>
    tpu.vector_store %arg7[%c0_121, %c0_122, %c0_123, %c0_124], %94 {strides = array<i32>} : memref<1x1x64x128xbf16, #tpu.memory_space<vmem>>, vector<1x1x64x8xbf16>,
    %95 = vector.extract_strided_slice %89 {offsets = [0, 21], sizes = [64, 8], strides = [1, 1]} : vector<64x128xf32> to vector<64x8xf32>
    %96 = arith.truncf %95 : vector<64x8xf32> to vector<64x8xbf16>
    %c0_125 = arith.constant 0 : index
    %c0_126 = arith.constant 0 : index
    %c0_127 = arith.constant 0 : index
    %c8 = arith.constant 8 : index
    %97 = vector.load %arg7[%c0_125, %c0_126, %c0_127, %c8] : memref<1x1x64x128xbf16, #tpu.memory_space<vmem>>, vector<1x1x64x8xbf16>
    %98 = vector.shape_cast %97 : vector<1x1x64x8xbf16> to vector<64x8xbf16>
    %99 = vector.shape_cast %96 : vector<64x8xbf16> to vector<1x1x64x8xbf16>
    tpu.vector_store %arg7[%c0_125, %c0_126, %c0_127, %c8], %99 {strides = array<i32>} : memref<1x1x64x128xbf16, #tpu.memory_space<vmem>>, vector<1x1x64x8xbf16>,
    %100 = vector.extract_strided_slice %89 {offsets = [0, 31], sizes = [64, 8], strides = [1, 1]} : vector<64x128xf32> to vector<64x8xf32>
    %101 = arith.truncf %100 : vector<64x8xf32> to vector<64x8xbf16>
    %c0_128 = arith.constant 0 : index
    %c0_129 = arith.constant 0 : index
    %c0_130 = arith.constant 0 : index
    %c16_131 = arith.constant 16 : index
    %102 = vector.load %arg7[%c0_128, %c0_129, %c0_130, %c16_131] : memref<1x1x64x128xbf16, #tpu.memory_space<vmem>>, vector<1x1x64x8xbf16>
    %103 = vector.shape_cast %102 : vector<1x1x64x8xbf16> to vector<64x8xbf16>
    %104 = vector.shape_cast %101 : vector<64x8xbf16> to vector<1x1x64x8xbf16>
    tpu.vector_store %arg7[%c0_128, %c0_129, %c0_130, %c16_131], %104 {strides = array<i32>} : memref<1x1x64x128xbf16, #tpu.memory_space<vmem>>, vector<1x1x64x8xbf16>,
    %105 = vector.extract_strided_slice %89 {offsets = [0, 41], sizes = [64, 8], strides = [1, 1]} : vector<64x128xf32> to vector<64x8xf32>
    %106 = arith.truncf %105 : vector<64x8xf32> to vector<64x8xbf16>
    %c0_132 = arith.constant 0 : index
    %c0_133 = arith.constant 0 : index
    %c0_134 = arith.constant 0 : index
    %c24 = arith.constant 24 : index
    %107 = vector.load %arg7[%c0_132, %c0_133, %c0_134, %c24] : memref<1x1x64x128xbf16, #tpu.memory_space<vmem>>, vector<1x1x64x8xbf16>
    %108 = vector.shape_cast %107 : vector<1x1x64x8xbf16> to vector<64x8xbf16>
    %109 = vector.shape_cast %106 : vector<64x8xbf16> to vector<1x1x64x8xbf16>
    tpu.vector_store %arg7[%c0_132, %c0_133, %c0_134, %c24], %109 {strides = array<i32>} : memref<1x1x64x128xbf16, #tpu.memory_space<vmem>>, vector<1x1x64x8xbf16>,
    %110 = vector.extract_strided_slice %89 {offsets = [0, 51], sizes = [64, 8], strides = [1, 1]} : vector<64x128xf32> to vector<64x8xf32>
    %111 = arith.truncf %110 : vector<64x8xf32> to vector<64x8xbf16>
    %c0_135 = arith.constant 0 : index
    %c0_136 = arith.constant 0 : index
    %c0_137 = arith.constant 0 : index
    %c32_138 = arith.constant 32 : index
    %112 = vector.load %arg7[%c0_135, %c0_136, %c0_137, %c32_138] : memref<1x1x64x128xbf16, #tpu.memory_space<vmem>>, vector<1x1x64x8xbf16>
    %113 = vector.shape_cast %112 : vector<1x1x64x8xbf16> to vector<64x8xbf16>
    %114 = vector.shape_cast %111 : vector<64x8xbf16> to vector<1x1x64x8xbf16>
    tpu.vector_store %arg7[%c0_135, %c0_136, %c0_137, %c32_138], %114 {strides = array<i32>} : memref<1x1x64x128xbf16, #tpu.memory_space<vmem>>, vector<1x1x64x8xbf16>,
    %115 = vector.extract_strided_slice %89 {offsets = [0, 61], sizes = [64, 8], strides = [1, 1]} : vector<64x128xf32> to vector<64x8xf32>
    %116 = arith.truncf %115 : vector<64x8xf32> to vector<64x8xbf16>
    %c0_139 = arith.constant 0 : index
    %c0_140 = arith.constant 0 : index
    %c0_141 = arith.constant 0 : index
    %c40 = arith.constant 40 : index
    %117 = vector.load %arg7[%c0_139, %c0_140, %c0_141, %c40] : memref<1x1x64x128xbf16, #tpu.memory_space<vmem>>, vector<1x1x64x8xbf16>
    %118 = vector.shape_cast %117 : vector<1x1x64x8xbf16> to vector<64x8xbf16>
    %119 = vector.shape_cast %116 : vector<64x8xbf16> to vector<1x1x64x8xbf16>
    tpu.vector_store %arg7[%c0_139, %c0_140, %c0_141, %c40], %119 {strides = array<i32>} : memref<1x1x64x128xbf16, #tpu.memory_space<vmem>>, vector<1x1x64x8xbf16>,
    %120 = vector.extract_strided_slice %89 {offsets = [0, 71], sizes = [64, 8], strides = [1, 1]} : vector<64x128xf32> to vector<64x8xf32>
    %121 = arith.truncf %120 : vector<64x8xf32> to vector<64x8xbf16>
    %c0_142 = arith.constant 0 : index
    %c0_143 = arith.constant 0 : index
    %c0_144 = arith.constant 0 : index
    %c48_145 = arith.constant 48 : index
    %122 = vector.load %arg7[%c0_142, %c0_143, %c0_144, %c48_145] : memref<1x1x64x128xbf16, #tpu.memory_space<vmem>>, vector<1x1x64x8xbf16>
    %123 = vector.shape_cast %122 : vector<1x1x64x8xbf16> to vector<64x8xbf16>
    %124 = vector.shape_cast %121 : vector<64x8xbf16> to vector<1x1x64x8xbf16>
    tpu.vector_store %arg7[%c0_142, %c0_143, %c0_144, %c48_145], %124 {strides = array<i32>} : memref<1x1x64x128xbf16, #tpu.memory_space<vmem>>, vector<1x1x64x8xbf16>,
    %125 = vector.extract_strided_slice %89 {offsets = [0, 81], sizes = [64, 8], strides = [1, 1]} : vector<64x128xf32> to vector<64x8xf32>
    %126 = arith.truncf %125 : vector<64x8xf32> to vector<64x8xbf16>
    %c0_146 = arith.constant 0 : index
    %c0_147 = arith.constant 0 : index
    %c0_148 = arith.constant 0 : index
    %c56 = arith.constant 56 : index
    %127 = vector.load %arg7[%c0_146, %c0_147, %c0_148, %c56] : memref<1x1x64x128xbf16, #tpu.memory_space<vmem>>, vector<1x1x64x8xbf16>
    %128 = vector.shape_cast %127 : vector<1x1x64x8xbf16> to vector<64x8xbf16>
    %129 = vector.shape_cast %126 : vector<64x8xbf16> to vector<1x1x64x8xbf16>
    tpu.vector_store %arg7[%c0_146, %c0_147, %c0_148, %c56], %129 {strides = array<i32>} : memref<1x1x64x128xbf16, #tpu.memory_space<vmem>>, vector<1x1x64x8xbf16>,
    %cst_149 = arith.constant 0.000000e+00 : bf16
    %130 = vector.broadcast %cst_149 : bf16 to vector<64x64xbf16>
    %c0_150 = arith.constant 0 : index
    %c0_151 = arith.constant 0 : index
    %c0_152 = arith.constant 0 : index
    %c64_153 = arith.constant 64 : index
    %131 = vector.load %arg7[%c0_150, %c0_151, %c0_152, %c64_153] : memref<1x1x64x128xbf16, #tpu.memory_space<vmem>>, vector<1x1x64x64xbf16>
    %132 = vector.shape_cast %131 : vector<1x1x64x64xbf16> to vector<64x64xbf16>
    %133 = vector.shape_cast %130 : vector<64x64xbf16> to vector<1x1x64x64xbf16>
    tpu.vector_store %arg7[%c0_150, %c0_151, %c0_152, %c64_153], %133 {strides = array<i32>} : memref<1x1x64x128xbf16, #tpu.memory_space<vmem>>, vector<1x1x64x64xbf16>,
    return
  }
  func.func @transform_0(%arg0: i32, %arg1: i32) -> (i32, i32, i32, i32) {
    %c0_i32 = arith.constant 0 : i32
    %c0_i32_0 = arith.constant 0 : i32
    %c0_i32_1 = arith.constant 0 : i32
    return %arg0, %arg1, %c0_i32, %c0_i32_0 : i32, i32, i32, i32
  }
  func.func @transform_1(%arg0: i32, %arg1: i32) -> (i32, i32, i32, i32) {
    %c1_i32 = arith.constant 1 : i32
    %0 = arith.addi %arg1, %c1_i32 : i32
    %c0_i32 = arith.constant 0 : i32
    %c0_i32_0 = arith.constant 0 : i32
    %c0_i32_1 = arith.constant 0 : i32
    return %arg0, %0, %c0_i32, %c0_i32_0 : i32, i32, i32, i32
  }
  func.func @transform_2(%arg0: i32, %arg1: i32) -> (i32, i32, i32, i32) {
    %c2_i32 = arith.constant 2 : i32
    %0 = arith.addi %arg1, %c2_i32 : i32
    %c0_i32 = arith.constant 0 : i32
    %c0_i32_0 = arith.constant 0 : i32
    %c0_i32_1 = arith.constant 0 : i32
    return %arg0, %0, %c0_i32, %c0_i32_0 : i32, i32, i32, i32
  }
  func.func @transform_3(%arg0: i32, %arg1: i32) -> (i32, i32) {
    %c0_i32 = arith.constant 0 : i32
    %c0_i32_0 = arith.constant 0 : i32
    %c0_i32_1 = arith.constant 0 : i32
    return %c0_i32, %c0_i32_0 : i32, i32
  }
  func.func @transform_4(%arg0: i32, %arg1: i32) -> (i32, i32) {
    %c0_i32 = arith.constant 0 : i32
    %c0_i32_0 = arith.constant 0 : i32
    %c0_i32_1 = arith.constant 0 : i32
    return %c0_i32, %c0_i32_0 : i32, i32
  }
  func.func @transform_5(%arg0: i32, %arg1: i32) -> (i32, i32, i32, i32) {
    %c0_i32 = arith.constant 0 : i32
    %c0_i32_0 = arith.constant 0 : i32
    %c0_i32_1 = arith.constant 0 : i32
    return %arg0, %arg1, %c0_i32, %c0_i32_0 : i32, i32, i32, i32
  }
}

</mosaic_0001>

<bundles_post_ra>
// kernel: tpu_custom_call.1
= control target key start
LH: loop header
LB: loop body
LE: loop exit
PB: predicated region body
PF: predicated region fallthrough
CT: control target
= control target key end

     0   :  { %s3084_s0 = inlined_call_operand.hbm [shape: bf16[2,6,8,256], index: 0, kind: input, shape index: {}]   ;;  %s3085_s1 = inlined_call_operand.hbm [shape: bf16[2,6,8,256], index: 1, kind: input, shape index: {}]   ;;  %s3086_s2 = inlined_call_operand.hbm [shape: bf16[2,6,8,256], index: 2, kind: input, shape index: {}]   ;;  %s3087_s3 = inlined_call_operand.vmem [shape: bf16[64,216], index: 3, kind: input, shape index: {}]   ;;  %s3088_s4 = inlined_call_operand.vmem [shape: f32[64,1], index: 4, kind: input, shape index: {}]   ;;  %s3089_s5 = inlined_call_operand.hbm [shape: bf16[2,4,64,128], index: 5, kind: output, shape index: {}]  }
   0x1   :  { %3106 = sst [smem:[#allocation22_spill]] %s3085_s1 }
   0x2   :  { %3107 = sst [smem:[#allocation23_spill]] %s3087_s3 }
   0x3   :  { %3108 = sst [smem:[#allocation24_spill]] %s3088_s4 }
   0x4   :  { %3109 = sst [smem:[#allocation25_spill]] %s3089_s5 }
   0x5   :  { %10 = vsyncpa [#allocation4], 0 }
   0x6   :  { %12 = vsyncpa [#allocation4 + $0x1], 0 }
   0x7   :  { %13 = vsyncpa [#allocation7], 0 }
   0x8   :  { %15 = vsyncpa [#allocation7 + $0x1], 0 }
   0x9   :  { %16 = vsyncpa [#allocation5], 0 }
   0xa   :  { %18 = vsyncpa [#allocation5 + $0x1], 0  ;;  %s2212_s18 = smov 0   ;;  %s2214_s19 = smov 0  }
   0xb   :  { %s2216_s20 = smov 0   ;;  %s2218_s21 = smov 0  }
   0xc   :  { %s2220_s22 = smov 0   ;;  %s2222_s23 = smov 0  }
   0xd   :  { %s2224_s24 = smov 0   ;;  %s2226_s25 = smov 0  }
   0xe   :  { %s2228_s26 = smov 0   ;;  %s2230_s27 = smov 0  }
   0xf   :  { %s2232_s28 = smov 0   ;;  %s2234_s29 = smov 0  }
  0x10   :  { %s2236_s30 = smov 0   ;;  %s2238_s6 = smov 0  }
  0x11 LB: > { %3110 = sst [smem:[#allocation14_spill]] %s2121_s22  ;;  %s2283_s7 = sadd.s32 4294967295, %s2157_s6   ;;  %s2157_s6 = sphi %s2238_s6, %s24_s6   ;;  %s2153_s30 = sphi %s2236_s30, %s3158_s30   ;;  %s2149_s29 = sphi %s2234_s29, %s3169_s29   ;;  %s2145_s28 = sphi %s2232_s28, %s3156_s28   ;;  %s2141_s27 = sphi %s2230_s27, %s3168_s27   ;;  %s2137_s26 = sphi %s2228_s26, %s3167_s26   ;;  %s2133_s25 = sphi %s2226_s25, %s3166_s25   ;;  %s2129_s24 = sphi %s2224_s24, %s3165_s24   ;;  %s2125_s23 = sphi %s2222_s23, %s3164_s23   ;;  %s2121_s22 = sphi %s2220_s22, %s3163_s22   ;;  %s2117_s21 = sphi %s2218_s21, %s3162_s21   ;;  %s2113_s20 = sphi %s2216_s20, %s3161_s20   ;;  %s2109_s19 = sphi %s2214_s19, %s3160_s19   ;;  %s2105_s18 = sphi %s2212_s18, %s3159_s18  }
  0x12   : > { %3111 = sst [smem:[#allocation15_spill]] %s2141_s27  ;;  %s33_s8 = sadd.s32 1, %s2149_s29 }
  0x13   : > { %3112 = sst [smem:[#allocation16_spill]] %s2145_s28  ;;  %p34_p0 = scmp.ge.s32.totalorder %s33_s8, 4 }
  0x14   : > { %3113 = sst [smem:[#allocation17_spill]] %s2153_s30  ;;  %s36_s9 = sadd.s32 1, %s2153_s30 }
  0x15   : > { %p3100_p1 = scmp.eq.s32.totalorder %s2157_s6, 0  ;;  %p3099_p2 = scmp.eq.s32.totalorder %s2283_s7, 0 }
  0x16   : > { %s2289_s10 = scalar_select %p34_p0, 0, %s33_s8  }
  0x17   : > { %s3171_s9 = smov (!%p34_p0, %s36_s9), %s2153_s30  ;;  %s75_s14 = sadd.s32 1, %s2125_s23 }
  0x18   : > { %3114 = sst [smem:[#allocation18_spill]] %s2289_s10  ;;  %s41_s11 = ssub.s32 %s2149_s29, %s2289_s10 }
  0x19   : > { %s69_s12 = sadd.s32 1, %s2289_s10  ;;  %p38_p3 = scmp.ge.s32.totalorder %s3171_s9, 2 }
  0x1a   : > { %s71_s13 = ssub.s32 %s33_s8, %s69_s12  ;;  %p82_p4 = scmp.ne.s32.totalorder %s2125_s23, %s2121_s22 }
  0x1b   : > { %s3173_s9 = smov (%p38_p3, %s3171_s9), 0  ;;  %p88_p6 = scmp.ne.s32.totalorder %s2121_s22, %s2117_s21 }
  0x1c   : > { %3115 = sst [smem:[#allocation19_spill]] %s3173_s9  ;;  %p2302_p5 = por %p82_p4, %p3100_p1 }
  0x1d   : > { %s40_s16 = ssub.s32 %s2153_s30, %s3173_s9  ;;  %s98_s17 = sadd.s32 2, %s2149_s29 }
  0x1e   : > { %s2311_s5 = sor.u32 %s41_s11, %s40_s16  ;;  %s72_s8 = sor.u32 %s71_s13, %s40_s16 }
  0x1f   : > { %p73_p8 = scmp.eq.s32.totalorder %s72_s8, 0  ;;  %p2316_p9 = por %p88_p6, %p3099_p2 }
  0x20   : > { %s99_s28 = sadd.s32 2, %s2289_s10  ;;  %p3098_p10 = scmp.lt.s32.totalorder %s2157_s6, 8 }
  0x21   : > { %s3117_s12 = scalar_select %p2316_p9, 1, 0 }
  0x22   : > { %s2322_s27 = scalar_select %p73_p8, %s2125_s23, %s75_s14  }
  0x23   : > { %3118 = sst [smem:[#allocation20_spill]] %s3117_s12  ;;  %s101_s4 = ssub.s32 %s98_s17, %s99_s28 }
  0x24   : > { %3119 = sst [smem:[#allocation21_spill]] %s2322_s27  ;;  %s102_s21 = sor.u32 %s101_s4, %s40_s16 }
  0x25   : > { %p2325_p11 = scmp.eq.s32.totalorder %s102_s21, 0  ;;  %s1578_s13 = sshll.u32 %s2149_s29, 1 }
  0x26   : > { %s1720_s8 = smul.u32 12, %s2153_s30  ;;  %s239_s9 = sand.u32 1, %s2157_s6  }
  0x27   : > { %s241_s3 = sand.u32 1, %s2125_s23   ;;  %s3121_s1 = sld [smem:[#allocation22_spill]] }
  0x28   : > { %s228_s22 = sadd.s32 %s1720_s8, %s1578_s13  ;;  %s1580_s12 = sshll.u32 %s241_s3, 3 }
  0x29   : > { %s2333_s10 = sshll.u32 %s228_s22, 6  ;;  %s243_s16 = scalar_lea.vmem [#allocation6], %s1580_s12 }
  0x2a   : > { %s254_s17 = sshll.u32 %s243_s16, 4  ;;  %p2347_p12 = pnand %p3098_p10, %p2302_p5  ;;  %s2341_s17 = int_to_ptr.vmem [resolvable:$true] %s254_s17 }
  0x2b   : > { %s2353_s22 = scalar_lea.sflag [#allocation7], %s239_s9 }
  0x2c   : > { %p1913_p4 = pneg %p2347_p12 }
  0x2d   : > { %s1477_s4 = scalar_lea.hbm %s3121_s1, %s2333_s10  ;;  %s1916_s13 = scalar_lea.hbm %s3121_s1, 1536 }
  0x2e   : > { %s2339_s27 = scalar_lea.hbm %s1477_s4, 128  ;;  %s1941_s12 = scalar_lea.hbm %s1477_s4, 256 }
  0x2f   : > { %p1912_p3 = scmp.ne.s32.totalorder %s2339_s27, %s1941_s12  ;;  %p1917_p5 = scmp.lt.u32.totalorder %s2339_s27, %s3121_s1 }
  0x30   : > { %p1918_p10 = scmp.lt.u32.totalorder %s1916_s13, %s1941_s12  ;;  %p1920_p1 = scmp.lt.u32.totalorder %s1941_s12, %s2339_s27 }
  0x31   : > { %p1914_p6 = pnand %p1913_p4, %p1912_p3 }
  0x32   : > { %p1919_p2 = por %p1918_p10, %p1917_p5 }
  0x33   : > { %p1915_p8 = pneg %p1914_p6 }
  0x34   : > { %p1921_p7 = por %p1920_p1, %p1919_p2 }
  0x36   : > { %p1922_p13 = pnand %p1921_p7, %p1915_p8 }
  0x38   : > { %1925 = shalt.err (!%p1922_p13)
}
  0x39   : > { %s1926_s9 = scalar_lea.vmem %s2341_s17, 128  ;;  %s2159_s14 = smov [#allocation6]  }
  0x3a   : > { %p1927_p3 = scmp.ne.s32.totalorder %s2341_s17, %s1926_s9  ;;  %s1931_s4 = sshll.u32 %s2159_s14, 4  ;;  %s1932_s4 = int_to_ptr.vmem [resolvable:$false] %s1931_s4 }
  0x3b   : > { %s1933_s16 = scalar_lea.vmem %s1932_s4, 256  ;;  %p1934_p9 = scmp.lt.s32.totalorder %s2341_s17, %s1932_s4 }
  0x3c   : > { %p1929_p6 = pnand %p1927_p3, %p1913_p4  ;;  %p1935_p10 = scmp.lt.s32.totalorder %s1933_s16, %s1926_s9 }
  0x3e   : > { %p1930_p0 = pneg %p1929_p6  ;;  %p1936_p5 = por %p1935_p10, %p1934_p9 }
  0x40   : > { %p1937_p1 = pnand %p1936_p5, %p1930_p0 }
  0x42   : > { %1940 = shalt.err (!%p1937_p1)
}
  0x43   : > { %1735 = dma.hbm_to_vmem [thread:$0]  (!%p2347_p12), %s2339_s27, 128, %s2341_s17, %s2353_s22  }
  0x44   : > { %p3123_p2 = scmp.lt.s32.totalorder %s2157_s6, 9  ;;  %p3124_p7 = scmp.ge.s32.totalorder %s2157_s6, 1 }
  0x45   : > { %s1574_s12 = sadd.s32 4294967294, %s2157_s6   ;;  %s45_s15 = sadd.s32 1, %s2137_s26 }
  0x46   : > { %p2384_p9 = pnand %p3124_p7, %p3123_p2  ;;  %p52_p13 = scmp.ne.s32.totalorder %s2137_s26, %s2133_s25 }
  0x47   : > { %p3126_p0 = scmp.eq.s32.totalorder %s2311_s5, 0  ;;  %p3127_p4 = scmp.eq.s32.totalorder %s2157_s6, 0 }
  0x48   : > { %s3125_s3 = scalar_select %p2384_p9, 1, 0 }
  0x49   : > { %s2395_s21 = scalar_select %p3126_p0, %s2137_s26, %s45_s15  }
  0x4a   : > { %p54_p8 = por %p3127_p4, %p52_p13  ;;  %p58_p3 = scmp.ne.s32.totalorder %s2133_s25, %s2129_s24 }
  0x4b   : > { %p186_p6 = scmp.eq.s32.totalorder %s2283_s7, 7  ;;  %p192_p10 = scmp.eq.s32.totalorder %s1574_s12, 7 }
  0x4c   : > { %p3128_p5 = scmp.eq.s32.totalorder %s2283_s7, 0  ;;  %s218_s17 = sand.u32 1, %s2137_s26  }
  0x4d   : > { %p2409_p1 = por %p186_p6, %p52_p13  ;;  %p2413_p2 = por %p192_p10, %p58_p3 }
  0x4e   : > { %p2404_p12 = por %p3128_p5, %p58_p3  ;;  %s1577_s5 = sshll.u32 %s218_s17, 3 }
  0x4f   : > { %s3130_s13 = scalar_select %p2409_p1, 1, 0 }
  0x50   : > { %s3129_s27 = scalar_select %p2404_p12, 1, 0 }
  0x51   : > { %s3131_s8 = scalar_select %p2413_p2, 1, 0 }
  0x52   : > { %s2421_s14 = scalar_lea.hbm %s3084_s0, %s2333_s10  ;;  %s222_s4 = scalar_lea.vmem [#allocation3], %s1577_s5 }
  0x53   : > { %s232_s16 = sshll.u32 %s222_s4, 4  ;;  %p3132_p7 = scmp.lt.s32.totalorder %s2157_s6, 8  ;;  %s2429_s16 = int_to_ptr.vmem [resolvable:$true] %s232_s16 }
  0x54   : > { %s219_s15 = scalar_lea.sflag [#allocation4], %s218_s17  ;;  %s1942_s1 = scalar_lea.hbm %s2421_s14, 128 }
  0x55   : > { %p2425_p13 = pnand %p3132_p7, %p54_p8  ;;  %p1943_p0 = scmp.ne.s32.totalorder %s2421_s14, %s1942_s1 }
  0x56   : > { %s1947_s9 = scalar_lea.hbm %s3084_s0, 1536  ;;  %p1948_p8 = scmp.lt.u32.totalorder %s2421_s14, %s3084_s0 }
  0x57   : > { %p1944_p4 = pneg %p2425_p13  ;;  %p1949_p10 = scmp.lt.u32.totalorder %s1947_s9, %s1942_s1 }
  0x58   : > { %p1951_p7 = scmp.lt.u32.totalorder %s1942_s1, %s2421_s14 }
  0x59   : > { %p1945_p3 = pnand %p1944_p4, %p1943_p0  ;;  %p1950_p5 = por %p1949_p10, %p1948_p8 }
  0x5b   : > { %p1946_p6 = pneg %p1945_p3  ;;  %p1952_p2 = por %p1951_p7, %p1950_p5 }
  0x5d   : > { %p1953_p1 = pnand %p1952_p2, %p1946_p6 }
  0x5f   : > { %1956 = shalt.err (!%p1953_p1)
}
  0x60   : > { %s1957_s17 = scalar_lea.vmem %s2429_s16, 128  ;;  %s2160_s5 = smov [#allocation3]  }
  0x61   : > { %p1958_p0 = scmp.ne.s32.totalorder %s2429_s16, %s1957_s17  ;;  %s1962_s28 = sshll.u32 %s2160_s5, 4  ;;  %s1963_s28 = int_to_ptr.vmem [resolvable:$false] %s1962_s28 }
  0x62   : > { %s1964_s30 = scalar_lea.vmem %s1963_s28, 256  ;;  %p1965_p9 = scmp.lt.s32.totalorder %s2429_s16, %s1963_s28 }
  0x63   : > { %p1960_p3 = pnand %p1958_p0, %p1944_p4  ;;  %p1966_p8 = scmp.lt.s32.totalorder %s1964_s30, %s1957_s17 }
  0x65   : > { %p1961_p12 = pneg %p1960_p3  ;;  %p1967_p10 = por %p1966_p8, %p1965_p9 }
  0x67   : > { %p1968_p5 = pnand %p1967_p10, %p1961_p12 }
  0x69   : > { %1971 = shalt.err (!%p1968_p5)
}
  0x6a   : > { %1732 = dma.hbm_to_vmem [thread:$0]  (!%p2425_p13), %s2421_s14, 128, %s2429_s16, %s219_s15  }
  0x6b   : > { %s105_s1 = sadd.s32 1, %s2113_s20  ;;  %p112_p9 = scmp.ne.s32.totalorder %s2113_s20, %s2109_s19 }
  0x6c   : > { %s2462_s9 = scalar_select %p2325_p11, %s2113_s20, %s105_s1  }
  0x6d   : > { %p3134_p12 = scmp.eq.s32.totalorder %s2157_s6, 0  ;;  %p118_p2 = scmp.ne.s32.totalorder %s2109_s19, %s2105_s18 }
  0x6e   : > { %s263_s12 = sand.u32 1, %s2113_s20   ;;  %s1486_s5 = scalar_lea.hbm %s3086_s2, %s2333_s10 }
  0x6f   : > { %p114_p1 = por %p112_p9, %p3134_p12  ;;  %p3135_p4 = scmp.eq.s32.totalorder %s2283_s7, 0 }
  0x70   : > { %s1583_s30 = sshll.u32 %s263_s12, 3  ;;  %s2479_s14 = scalar_lea.hbm %s1486_s5, 256 }
  0x71   : > { %p2475_p6 = por %p118_p2, %p3135_p4  ;;  %s265_s11 = scalar_lea.vmem [#allocation8], %s1583_s30 }
  0x72   : > { %s276_s16 = sshll.u32 %s265_s11, 4  ;;  %p3137_p11 = scmp.lt.s32.totalorder %s2157_s6, 8  ;;  %s277_s16 = int_to_ptr.vmem [resolvable:$true] %s276_s16 }
  0x73   : > { %s3136_s28 = scalar_select %p2475_p6, 1, 0 }
  0x74   : > { %p2483_p13 = pnand %p3137_p11, %p114_p1  ;;  %s2002_s10 = scalar_lea.hbm %s1486_s5, 384 }
  0x75   : > { %p1973_p7 = scmp.ne.s32.totalorder %s2479_s14, %s2002_s10  ;;  %s1977_s12 = scalar_lea.hbm %s3086_s2, 1536 }
  0x76   : > { %p1974_p0 = pneg %p2483_p13  ;;  %p1978_p10 = scmp.lt.u32.totalorder %s2479_s14, %s3086_s2 }
  0x77   : > { %p1979_p5 = scmp.lt.u32.totalorder %s1977_s12, %s2002_s10  ;;  %p1981_p12 = scmp.lt.u32.totalorder %s2002_s10, %s2479_s14 }
  0x78   : > { %p1975_p3 = pnand %p1974_p0, %p1973_p7 }
  0x79   : > { %p1980_p9 = por %p1979_p5, %p1978_p10 }
  0x7a   : > { %p1976_p8 = pneg %p1975_p3 }
  0x7b   : > { %p1982_p1 = por %p1981_p12, %p1980_p9 }
  0x7d   : > { %p1983_p2 = pnand %p1982_p1, %p1976_p8 }
  0x7f   : > { %1986 = shalt.err (!%p1983_p2)
}
  0x80   : > { %s1987_s5 = scalar_lea.vmem %s277_s16, 128  ;;  %s2161_s30 = smov [#allocation8]  }
  0x81   : > { %p1988_p4 = scmp.ne.s32.totalorder %s277_s16, %s1987_s5  ;;  %s1992_s11 = sshll.u32 %s2161_s30, 4  ;;  %s1993_s11 = int_to_ptr.vmem [resolvable:$false] %s1992_s11 }
  0x82   : > { %s1994_s15 = scalar_lea.vmem %s1993_s11, 256  ;;  %p1995_p3 = scmp.lt.s32.totalorder %s277_s16, %s1993_s11 }
  0x83   : > { %p1990_p11 = pnand %p1988_p4, %p1974_p0  ;;  %p1996_p6 = scmp.lt.s32.totalorder %s1994_s15, %s1987_s5 }
  0x85   : > { %p1991_p7 = pneg %p1990_p11  ;;  %p1997_p5 = por %p1996_p6, %p1995_p3 }
  0x87   : > { %p1998_p10 = pnand %p1997_p5, %p1991_p7 }
  0x89   : > { %2001 = shalt.err (!%p1998_p10)
}
  0x8a   : > { %1738 = dma.hbm_to_vmem [thread:$0]  (!%p2483_p13), %s2479_s14, 128, %s277_s16, %s2353_s22  }
  0x8b   : > { %p3139_p8 = scmp.ne.s32.totalorder %s3125_s3, 0 }
  0x8c   : > { %s2511_s10 = sand.u32 (!%p3139_p8), 1, %s2133_s25   ;;  %p3140_p6 = scmp.ne.s32.totalorder (!%p3139_p8), %s3129_s27, 0 }
  0x8d   : > { %285 = sbr.rel (%p3139_p8) target bundleno = 944 (0x3b0), region = 40  ;;  %s1587_s1 = sshll.u32 (!%p3139_p8), %s2511_s10, 3 }
  0x8e   : > { %s288_s12 = scalar_lea.sflag (!%p3139_p8), [#allocation4], %s2511_s10  ;;  %s2515_s4 = scalar_lea.vmem (!%p3139_p8), [#allocation3], %s1587_s1 }
  0x94   : > { %2088 = dma.done.wait (%p3140_p6), %s288_s12, 128  }
  0x95   : > { %2090 = vsyncadd (%p3140_p6), %s288_s12, 4294967168  ;;  %s3141_s22 = sld [smem:[#allocation14_spill]]  ;;  %s3142_s14 = sld [smem:[#allocation20_spill]] }
  0x96   : > { %s296_s3 = sand.u32 1, %s2283_s7  }
  0x97   : > { %s297_s17 = scalar_lea.sflag [#allocation7], %s296_s3 }
  0x9b   : > { %s298_s16 = sand.u32 1, %s3141_s22   ;;  %p3143_p13 = scmp.ne.s32.totalorder %s3142_s14, 0 }
  0x9c   : > { %s1588_s18 = sshll.u32 %s298_s16, 3 }
  0x9d   : > { %s300_s5 = scalar_lea.vmem [#allocation6], %s1588_s18 }
  0x9e   : > { %2092 = dma.done.wait (%p3143_p13), %s297_s17, 128  }
  0x9f   : > { %2094 = vsyncadd (%p3143_p13), %s297_s17, 4294967168  ;;  %s307_s30 = sand.u32 1, %s2109_s19   ;;  %p3144_p0 = scmp.ne.s32.totalorder %s3136_s28, 0 }
  0xa0   : > { %s2528_s11 = sshll.u32 %s307_s30, 3 }
  0xa1   : > { %s309_s27 = scalar_lea.vmem [#allocation8], %s2528_s11 }
  0xa2   : > { %2096 = dma.done.wait (%p3144_p0), %s297_s17, 128  }
  0xa3   : > { %2098 = vsyncadd (%p3144_p0), %s297_s17, 4294967168  ;;  %v414_v0 = vld [vmem:[%s2515_s4] sm:$0xff]  ;;  %s2162_s7 = smov 127   ;;  %s2163_s15 = smov 120   ;;  %v528_v3 = vld [vmem:[%s300_s5] sm:$0xff]  ;;  %vm360_vm0 = vcmask 1039360  }
  0xa4   : > { %v2536_v1 = vcombine.low %v414_v0, %v414_v0  ;;  %v2538_v2 = vcombine.high %v414_v0, %v414_v0  ;;  %v1880_v4 = vld [vmem:[%s300_s5] ss:$0 sps:$4 sm:$0xff]   ;;  %v2550_v5 = vcombine.low %v528_v3, %v528_v3  ;;  %s2164_s28 = smov 22   ;;  %v2554_v6 = vcombine.high %v528_v3, %v528_v3  ;;  %v2565_v7 = vld [vmem:[%s309_s27] sm:$0xff]  ;;  %s2166_s1 = smov 126  }
  0xa5   : > { %v2572_v8 = vcombine.low %v2565_v7, %v2565_v7  ;;  %v2579_v9 = vcombine.high %v2565_v7, %v2565_v7  ;;  %vm362_vm1 = vcmask 1043456   ;;  %vm385_vm2 = vcmask 982016   ;;  %s2167_s12 = smov 117   ;;  %s2168_s22 = smov 108  }
  0xa6   : > { %420 = vrot.lane.b32.xlu1 %v2536_v1, %s2162_s7  ;;  %381 = vrot.lane.b32.xlu0 %v2536_v1, %s2163_s15  ;;  %v2165_v12 = vmov 0   ;;  %s2169_s14 = smov 106   ;;  %s2170_s3 = smov 118   ;;  %vm1022_vm3 = vcmask 719872   ;;  %vm407_vm4 = vcmask 1031168   ;;  %vm445_vm5 = vcmask 957440  }
  0xa7   : > { %1038 = vmatprep.subr.bf16.mxu0 %v2165_v12  ;;  %1692 = vmatprep.subr.bf16.mxu1 %v2165_v12  ;;  %s2171_s16 = smov 116   ;;  %s2172_s18 = smov 107   ;;  %vm483_vm6 = vcmask 883712   ;;  %vm521_vm7 = vcmask 867328   ;;  %vm596_vm8 = vcmask 965632   ;;  %vm634_vm9 = vcmask 949248  }
  0xa8   : > { %1877 = vset.pattern.permute.xlu1 %v2165_v12  ;;  %1876 = vset.pattern.permute.xlu0 %v2165_v12  ;;  %s3145_s5 = sld [smem:[#allocation23_spill]]  ;;  %vm672_vm10 = vcmask 875520   ;;  %s2173_s11 = smov 115   ;;  %vm1167_vm11 = vcmask 60416   ;;  %vm1200_vm12 = vcmask 126016   ;;  %vm1233_vm13 = vcmask 191616  }
  0xa9   : > { %s2176_s17 = smov 109   ;;  %s2177_s30 = smov 105   ;;  %vm1266_vm14 = vcmask 257216   ;;  %vm1299_vm15 = vcmask 322816  }
  0xaa   : > { %422 = vrot.lane.b32.xlu1 %v2538_v2, %s2162_s7  ;;  %383 = vrot.lane.b32.xlu0 %v2538_v2, %s2163_s15  ;;  %p3150_p12 = scmp.ne.s32.totalorder %s3130_s13, 0 }
  0xae   : > { %460 = vrot.lane.b32.xlu1 %v2538_v2, %s2162_s7  ;;  %458 = vrot.lane.b32.xlu0 %v2536_v1, %s2162_s7 }
  0xb2   : > { %500 = vrot.lane.b32.xlu0 %v1880_v4, %s2164_s28  ;;  %534 = vrot.lane.b32.xlu1 %v2550_v5, %s2162_s7  ;;  %s3148_s28 = sld [smem:[#allocation16_spill]] }
  0xb6   : > { %536 = vrot.lane.b32.xlu0 %v2554_v6, %s2162_s7  ;;  %571 = vrot.lane.b32.xlu1 %v2550_v5, %s2162_s7 }
  0xba   : > { %573 = vrot.lane.b32.xlu0 %v2554_v6, %s2162_s7  ;;  %609 = vrot.lane.b32.xlu1 %v2550_v5, %s2163_s15 }
  0xbe   : > { %611 = vrot.lane.b32.xlu0 %v2554_v6, %s2163_s15  ;;  %647 = vrot.lane.b32.xlu1 %v2550_v5, %s2162_s7 }
  0xc2   : > { %649 = vrot.lane.b32.xlu0 %v2554_v6, %s2162_s7  ;;  %709 = vrot.lane.b32.xlu1 %v2572_v8, %s2163_s15 }
  0xc6   : > { %711 = vrot.lane.b32.xlu0 %v2579_v9, %s2163_s15  ;;  %746 = vrot.lane.b32.xlu1 %v2572_v8, %s2162_s7 }
  0xca   : > { %748 = vrot.lane.b32.xlu0 %v2579_v9, %s2162_s7  ;;  %783 = vrot.lane.b32.xlu1 %v2572_v8, %s2162_s7 }
  0xce   : > { %785 = vrot.lane.b32.xlu0 %v2579_v9, %s2162_s7  ;;  %356 = vrot.lane.b32.xlu1 %v2536_v1, %s2162_s7 }
  0xd2   : > { %358 = vrot.lane.b32.xlu0 %v2538_v2, %s2162_s7 }
 0x118   : > { %v421_v10 = vpop.permute.xlu1 %420  ;;  %v382_v11 = vpop.permute.xlu0 %381 }
 0x11c   : > { %v423_v13 = vpop.permute.xlu1 %422  ;;  %v384_v14 = vpop.permute.xlu0 %383 }
 0x11d   : > { %v424_v15 = vsel %vm360_vm0, %v421_v10, %v423_v13  ;;  %v386_v16 = vsel %vm385_vm2, %v382_v11, %v384_v14  ;;  %v392_v17 = vsel %vm362_vm1, %v2538_v2, %v384_v14  ;;  %v430_v21 = vsel %vm362_vm1, %v2538_v2, %v423_v13 }
 0x11e   : > { %v389_v18 = vsel %vm362_vm1, %v2536_v1, %v386_v16  ;;  %v427_v24 = vsel %vm362_vm1, %v2536_v1, %v424_v15 }
 0x11f   : > { %v1598_v19 = vcombine.high %v389_v18, %v392_v17  ;;  %v1597_v20 = vcombine.low %v389_v18, %v392_v17  ;;  %v1602_v28 = vcombine.high %v427_v24, %v430_v21  ;;  %v1601_v29 = vcombine.low %v427_v24, %v430_v21  ;;  %v349_v21 = vld [vmem:[%s2515_s4] sm:$0xf]  ;;  %s2175_s4 = smov 111  }
 0x120   : > { %v461_v22 = vpop.permute.xlu1 %460  ;;  %v459_v23 = vpop.permute.xlu0 %458 }
 0x121   : > { %403 = vrot.lane.b32.xlu0 %v1598_v19, %s2166_s1  ;;  %401 = vrot.lane.b32.xlu1 %v1597_v20, %s2166_s1  ;;  %v462_v25 = vsel %vm360_vm0, %v459_v23, %v461_v22  ;;  %v468_v26 = vsel %vm362_vm1, %v2538_v2, %v461_v22 }
 0x122   : > { %v465_v27 = vsel %vm362_vm1, %v2536_v1, %v462_v25 }
 0x123   : > { %v1606_v32 = vcombine.high %v465_v27, %v468_v26  ;;  %v1605_v33 = vcombine.low %v465_v27, %v468_v26 }
 0x124   : > { %v501_v30 = vpop.permute.xlu0 %500  ;;  %v535_v31 = vpop.permute.xlu1 %534 }
 0x125   : > { %441 = vrot.lane.b32.xlu0 %v1602_v28, %s2167_s12  ;;  %439 = vrot.lane.b32.xlu1 %v1601_v29, %s2167_s12  ;;  %v504_v34 = vsel %vm362_vm1, %v2536_v1, %v501_v30  ;;  %v506_v35 = vsel %vm362_vm1, %v2538_v2, %v501_v30 }
 0x126   : > { %v1611_v39 = vcombine.high %v504_v34, %v506_v35  ;;  %v1610_v40 = vcombine.low %v504_v34, %v506_v35 }
 0x128   : > { %v537_v36 = vpop.permute.xlu0 %536  ;;  %v572_v37 = vpop.permute.xlu1 %571 }
 0x129   : > { %479 = vrot.lane.b32.xlu0 %v1606_v32, %s2168_s22  ;;  %477 = vrot.lane.b32.xlu1 %v1605_v33, %s2168_s22  ;;  %v538_v38 = vsel %vm360_vm0, %v535_v31, %v537_v36  ;;  %v544_v41 = vsel %vm362_vm1, %v2554_v6, %v537_v36  ;;  %v1904_v33 = vld [vmem:[%s3145_s5 + $0x24] ss:$8 sps:$4 sm:$0xff]  }
 0x12a   : > { %v541_v42 = vsel %vm362_vm1, %v2550_v5, %v538_v38  ;;  %1668 = vmatprep.mubr.msk.bf16.mxu1 %vm1022_vm3, %v1904_v33 }
 0x12b   : > { %v1615_v46 = vcombine.high %v541_v42, %v544_v41  ;;  %v1614_v47 = vcombine.low %v541_v42, %v544_v41 }
 0x12c   : > { %v574_v43 = vpop.permute.xlu0 %573  ;;  %v610_v44 = vpop.permute.xlu1 %609 }
 0x12d   : > { %517 = vrot.lane.b32.xlu0 %v1611_v39, %s2169_s14  ;;  %515 = vrot.lane.b32.xlu1 %v1610_v40, %s2169_s14  ;;  %v575_v45 = vsel %vm360_vm0, %v572_v37, %v574_v43  ;;  %v581_v48 = vsel %vm362_vm1, %v2554_v6, %v574_v43 }
 0x12e   : > { %v578_v49 = vsel %vm362_vm1, %v2550_v5, %v575_v45 }
 0x12f   : > { %v1619_v53 = vcombine.high %v578_v49, %v581_v48  ;;  %v1618_v54 = vcombine.low %v578_v49, %v581_v48 }
 0x130   : > { %v612_v50 = vpop.permute.xlu0 %611  ;;  %v648_v51 = vpop.permute.xlu1 %647 }
 0x131   : > { %555 = vrot.lane.b32.xlu0 %v1615_v46, %s2162_s7  ;;  %553 = vrot.lane.b32.xlu1 %v1614_v47, %s2162_s7  ;;  %v613_v52 = vsel %vm385_vm2, %v610_v44, %v612_v50  ;;  %v619_v55 = vsel %vm362_vm1, %v2554_v6, %v612_v50 }
 0x132   : > { %v616_v56 = vsel %vm362_vm1, %v2550_v5, %v613_v52 }
 0x133   : > { %v1623_v60 = vcombine.high %v616_v56, %v619_v55  ;;  %v1622_v61 = vcombine.low %v616_v56, %v619_v55 }
 0x134   : > { %v650_v57 = vpop.permute.xlu0 %649  ;;  %v710_v58 = vpop.permute.xlu1 %709 }
 0x135   : > { %592 = vrot.lane.b32.xlu0 %v1619_v53, %s2170_s3  ;;  %590 = vrot.lane.b32.xlu1 %v1618_v54, %s2170_s3  ;;  %v651_v59 = vsel %vm360_vm0, %v648_v51, %v650_v57  ;;  %v657_v62 = vsel %vm362_vm1, %v2554_v6, %v650_v57 }
 0x136   : > { %v654_v63 = vsel %vm362_vm1, %v2550_v5, %v651_v59 }
 0x137   : > { %v1627_v2 = vcombine.high %v654_v63, %v657_v62  ;;  %v1626_v3 = vcombine.low %v654_v63, %v657_v62 }
 0x138   : > { %v712_v0 = vpop.permute.xlu0 %711  ;;  %v747_v1 = vpop.permute.xlu1 %746 }
 0x139   : > { %630 = vrot.lane.b32.xlu0 %v1623_v60, %s2171_s16  ;;  %628 = vrot.lane.b32.xlu1 %v1622_v61, %s2171_s16  ;;  %v713_v4 = vsel %vm385_vm2, %v710_v58, %v712_v0  ;;  %v719_v6 = vsel %vm362_vm1, %v2579_v9, %v712_v0  ;;  %vm1398_vm2 = vcmask 519616  }
 0x13a   : > { %v716_v5 = vsel %vm362_vm1, %v2572_v8, %v713_v4 }
 0x13b   : > { %v1635_v15 = vcombine.high %v716_v5, %v719_v6  ;;  %v1634_v16 = vcombine.low %v716_v5, %v719_v6 }
 0x13c   : > { %v749_v10 = vpop.permute.xlu0 %748  ;;  %v784_v11 = vpop.permute.xlu1 %783 }
 0x13d   : > { %668 = vrot.lane.b32.xlu0 %v1627_v2, %s2172_s18  ;;  %666 = vrot.lane.b32.xlu1 %v1626_v3, %s2172_s18  ;;  %v750_v13 = vsel %vm360_vm0, %v747_v1, %v749_v10  ;;  %v756_v17 = vsel %vm362_vm1, %v2579_v9, %v749_v10 }
 0x13e   : > { %v753_v18 = vsel %vm362_vm1, %v2572_v8, %v750_v13 }
 0x13f   : > { %v1639_v23 = vcombine.high %v753_v18, %v756_v17  ;;  %v1638_v24 = vcombine.low %v753_v18, %v756_v17 }
 0x140   : > { %v786_v14 = vpop.permute.xlu0 %785  ;;  %v357_v19 = vpop.permute.xlu1 %356 }
 0x141   : > { %688 = vrot.lane.b32.xlu0 %v2579_v9, %s2162_s7  ;;  %686 = vrot.lane.b32.xlu1 %v2572_v8, %s2162_s7  ;;  %v787_v20 = vsel %vm360_vm0, %v784_v11, %v786_v14  ;;  %v793_v26 = vsel %vm362_vm1, %v2579_v9, %v786_v14  ;;  %s2178_s7 = smov 103  }
 0x142   : > { %v790_v27 = vsel %vm362_vm1, %v2572_v8, %v787_v20  ;;  %v1901_v8 = vld [vmem:[%s3145_s5 + $0x4] ss:$8 sps:$4 sm:$0xff]  }
 0x143   : > { %v1643_v31 = vcombine.high %v790_v27, %v793_v26  ;;  %v1642_v32 = vcombine.low %v790_v27, %v793_v26  ;;  %1666 = vmatprep.mubr.msk.bf16.mxu0 %vm1022_vm3, %v1901_v8 }
 0x144   : > { %v359_v22 = vpop.permute.xlu0 %358 }
 0x145   : > { %730 = vrot.lane.b32.xlu0 %v1635_v15, %s2166_s1  ;;  %728 = vrot.lane.b32.xlu1 %v1634_v16, %s2166_s1  ;;  %v361_v25 = vsel %vm360_vm0, %v357_v19, %v359_v22  ;;  %s3146_s1 = sld [smem:[#allocation24_spill]] }
 0x146   : > { %v365_v28 = vsel %vm362_vm1, %v349_v21, %v361_v25 }
 0x147   : > { %v1593_v29 = vcombine.low %v365_v28, %v365_v28  ;;  %v1594_v30 = vcombine.high %v365_v28, %v365_v28 }
 0x149   : > { %767 = vrot.lane.b32.xlu0 %v1639_v23, %s2167_s12  ;;  %765 = vrot.lane.b32.xlu1 %v1638_v24, %s2167_s12  ;;  %373 = vst [vmem:[#allocation2] sm:$0xf] %v1593_v29  ;;  %374 = vst [vmem:[#allocation2 + $0x4] sm:$0xf] %v1594_v30 }
 0x14b   : > { %v858_v34 = vld [vmem:[%s3146_s1 + $0x8] sm:$0xff]  ;;  %v860_v35 = vld [vmem:[%s3146_s1 + $0x18] sm:$0xff]  ;;  %v859_v36 = vld [vmem:[%s3146_s1 + $0x10] sm:$0xff] }
 0x14c   : > { %v862_v37 = vld [vmem:[%s3146_s1 + $0x28] sm:$0xff]  ;;  %v861_v38 = vld [vmem:[%s3146_s1 + $0x20] sm:$0xff]  ;;  %v864_v39 = vld [vmem:[%s3146_s1 + $0x38] sm:$0xff] }
 0x14d   : > { %804 = vrot.lane.b32.xlu0 %v1643_v31, %s2168_s22  ;;  %802 = vrot.lane.b32.xlu1 %v1642_v32, %s2168_s22  ;;  %v863_v40 = vld [vmem:[%s3146_s1 + $0x30] sm:$0xff] }
 0x14e   : > { %v679_v32 = vld [vmem:[%s309_s27] sm:$0xf]  ;;  %s2174_s27 = smov 113  }
 0x150   : > { %v1885_v9 = vld [vmem:[#allocation2] sm:$0xff]  }
 0x151   : > { %816 = vrot.lane.b32.xlu1 %v2565_v7, %s2169_s14  ;;  %1039 = vmatpush1.bf16.msra.mxu0 %v1885_v9  ;;  %v857_v7 = vld [vmem:[%s3146_s1] sm:$0xff]  ;;  %s1680_s14 = sshll.u32 %s3148_s28, 5 }
 0x152   : > { %1706 = vmatpush1.bf16.msra.mxu1 %v1885_v9  ;;  %1040 = vmatprep.subr.bf16.mxu0 %v2165_v12 }
 0x153   : > { %1693 = vmatprep.subr.bf16.mxu1 %v2165_v12  ;;  %867 = vperm.xlu0 %1876, %v857_v7  }
 0x155   : > { %872 = vperm.xlu1 %1877, %v858_v34  }
 0x157   : > { %882 = vperm.xlu0 %1876, %v860_v35  }
 0x159   : > { %877 = vperm.xlu1 %1877, %v859_v36  }
 0x15b   : > { %892 = vperm.xlu0 %1876, %v862_v37  }
 0x15d   : > { %887 = vperm.xlu1 %1877, %v861_v38  }
 0x15f   : > { %902 = vperm.xlu0 %1876, %v864_v39  }
 0x161   : > { %897 = vperm.xlu1 %1877, %v863_v40  }
 0x193   : > { %v404_v41 = vpop.permute.xlu0 %403  ;;  %v402_v42 = vpop.permute.xlu1 %401 }
 0x194   : > { %v406_v43 = vrot.slane %v404_v41, 4  ;;  %v405_v44 = vrot.slane %v402_v42, 4 }
 0x196   : > { %v409_v45 = vsel %vm407_vm4, %v404_v41, %v406_v43  ;;  %v408_v46 = vsel %vm407_vm4, %v402_v42, %v405_v44 }
 0x197   : > { %413 = vst [vmem:[#allocation2 + $0xc] sm:$0xf] %v409_v45  ;;  %412 = vst [vmem:[#allocation2 + $0x8] sm:$0xf] %v408_v46  ;;  %v442_v47 = vpop.permute.xlu0 %441  ;;  %v440_v48 = vpop.permute.xlu1 %439 }
 0x198   : > { %v444_v49 = vrot.slane %v442_v47, 4  ;;  %v443_v50 = vrot.slane %v440_v48, 4 }
 0x19a   : > { %v447_v51 = vsel %vm445_vm5, %v442_v47, %v444_v49  ;;  %v446_v52 = vsel %vm445_vm5, %v440_v48, %v443_v50 }
 0x19b   : > { %451 = vst [vmem:[#allocation2 + $0x14] sm:$0xf] %v447_v51  ;;  %450 = vst [vmem:[#allocation2 + $0x10] sm:$0xf] %v446_v52  ;;  %v480_v53 = vpop.permute.xlu0 %479  ;;  %v478_v54 = vpop.permute.xlu1 %477 }
 0x19c   : > { %v482_v55 = vrot.slane %v480_v53, 4  ;;  %v481_v56 = vrot.slane %v478_v54, 4 }
 0x19e   : > { %v485_v57 = vsel %vm483_vm6, %v480_v53, %v482_v55  ;;  %v484_v58 = vsel %vm483_vm6, %v478_v54, %v481_v56  ;;  %v1886_v59 = vld [vmem:[#allocation2 + $0x8] sm:$0xff]  }
 0x19f   : > { %489 = vst [vmem:[#allocation2 + $0x1c] sm:$0xf] %v485_v57  ;;  %488 = vst [vmem:[#allocation2 + $0x18] sm:$0xf] %v484_v58  ;;  %v518_v60 = vpop.permute.xlu0 %517  ;;  %v516_v61 = vpop.permute.xlu1 %515  ;;  %1041 = vmatpush1.bf16.msra.mxu0 %v1886_v59  ;;  %1707 = vmatpush1.bf16.msra.mxu1 %v1886_v59 }
 0x1a0   : > { %v520_v62 = vrot.slane %v518_v60, 4  ;;  %v519_v63 = vrot.slane %v516_v61, 4  ;;  %1042 = vmatprep.subr.bf16.mxu0 %v2165_v12  ;;  %1694 = vmatprep.subr.bf16.mxu1 %v2165_v12 }
 0x1a2   : > { %v523_v0 = vsel %vm521_vm7, %v518_v60, %v520_v62  ;;  %v522_v1 = vsel %vm521_vm7, %v516_v61, %v519_v63  ;;  %v1887_v2 = vld [vmem:[#allocation2 + $0x10] sm:$0xff]  }
 0x1a3   : > { %527 = vst [vmem:[#allocation2 + $0x24] sm:$0xf] %v523_v0  ;;  %526 = vst [vmem:[#allocation2 + $0x20] sm:$0xf] %v522_v1  ;;  %v556_v3 = vpop.permute.xlu0 %555  ;;  %v554_v4 = vpop.permute.xlu1 %553  ;;  %1043 = vmatpush1.bf16.msra.mxu0 %v1887_v2  ;;  %1708 = vmatpush1.bf16.msra.mxu1 %v1887_v2 }
 0x1a4   : > { %v558_v10 = vrot.slane %v556_v3, 4  ;;  %v557_v6 = vrot.slane %v554_v4, 4  ;;  %1044 = vmatprep.subr.bf16.mxu0 %v2165_v12  ;;  %1695 = vmatprep.subr.bf16.mxu1 %v2165_v12 }
 0x1a6   : > { %v560_v5 = vsel %vm360_vm0, %v556_v3, %v558_v10  ;;  %v559_v11 = vsel %vm360_vm0, %v554_v4, %v557_v6  ;;  %v1888_v13 = vld [vmem:[#allocation2 + $0x18] sm:$0xff]   ;;  %v1899_v4 = vld [vmem:[%s3145_s5] ss:$8 sps:$4 sm:$0xff]  }
 0x1a7   : > { %564 = vst [vmem:[#allocation2 + $0x2c] sm:$0xf] %v560_v5  ;;  %563 = vst [vmem:[#allocation2 + $0x28] sm:$0xf] %v559_v11  ;;  %v593_v14 = vpop.permute.xlu0 %592  ;;  %v591_v15 = vpop.permute.xlu1 %590  ;;  %1045 = vmatpush1.bf16.msra.mxu0 %v1888_v13  ;;  %1709 = vmatpush1.bf16.msra.mxu1 %v1888_v13  ;;  %v1902_v10 = vld [vmem:[%s3145_s5 + $0x20] ss:$8 sps:$4 sm:$0xff]  }
 0x1a8   : > { %v595_v16 = vrot.slane %v593_v14, 4  ;;  %v594_v17 = vrot.slane %v591_v15, 4  ;;  %1046 = vmatprep.subr.bf16.mxu0 %v2165_v12  ;;  %1696 = vmatprep.subr.bf16.mxu1 %v2165_v12  ;;  %v1905_v6 = vld [vmem:[%s3145_s5 + $0x14] ss:$8 sps:$4 sm:$0xff]   ;;  %v1909_v11 = vld [vmem:[%s3145_s5 + $0x10] ss:$8 sps:$4 sm:$0xff]  }
 0x1a9   : > { %v1907_v5 = vld [vmem:[%s3145_s5 + $0x34] ss:$8 sps:$4 sm:$0xff]   ;;  %v1910_v13 = vld [vmem:[%s3145_s5 + $0x30] ss:$8 sps:$4 sm:$0xff]  }
 0x1aa   : > { %v598_v18 = vsel %vm596_vm8, %v593_v14, %v595_v16  ;;  %v597_v19 = vsel %vm596_vm8, %v591_v15, %v594_v17  ;;  %v1889_v20 = vld [vmem:[#allocation2 + $0x20] sm:$0xff]  }
 0x1ab   : > { %602 = vst [vmem:[#allocation2 + $0x34] sm:$0xf] %v598_v18  ;;  %601 = vst [vmem:[#allocation2 + $0x30] sm:$0xf] %v597_v19  ;;  %v631_v21 = vpop.permute.xlu0 %630  ;;  %v629_v22 = vpop.permute.xlu1 %628  ;;  %1047 = vmatpush1.bf16.msra.mxu0 %v1889_v20  ;;  %1710 = vmatpush1.bf16.msra.mxu1 %v1889_v20 }
 0x1ac   : > { %v633_v23 = vrot.slane %v631_v21, 4  ;;  %v632_v24 = vrot.slane %v629_v22, 4  ;;  %1048 = vmatprep.subr.bf16.mxu0 %v2165_v12  ;;  %1697 = vmatprep.subr.bf16.mxu1 %v2165_v12 }
 0x1ae   : > { %v636_v25 = vsel %vm634_vm9, %v631_v21, %v633_v23  ;;  %v635_v26 = vsel %vm634_vm9, %v629_v22, %v632_v24  ;;  %v1890_v27 = vld [vmem:[#allocation2 + $0x28] sm:$0xff]  }
 0x1af   : > { %640 = vst [vmem:[#allocation2 + $0x3c] sm:$0xf] %v636_v25  ;;  %639 = vst [vmem:[#allocation2 + $0x38] sm:$0xf] %v635_v26  ;;  %v669_v28 = vpop.permute.xlu0 %668  ;;  %v667_v29 = vpop.permute.xlu1 %666  ;;  %1049 = vmatpush1.bf16.msra.mxu0 %v1890_v27  ;;  %1711 = vmatpush1.bf16.msra.mxu1 %v1890_v27 }
 0x1b0   : > { %v671_v30 = vrot.slane %v669_v28, 4  ;;  %v670_v31 = vrot.slane %v667_v29, 4  ;;  %1050 = vmatprep.subr.bf16.mxu0 %v2165_v12  ;;  %1698 = vmatprep.subr.bf16.mxu1 %v2165_v12 }
 0x1b2   : > { %v674_v9 = vsel %vm672_vm10, %v669_v28, %v671_v30  ;;  %v673_v8 = vsel %vm672_vm10, %v667_v29, %v670_v31  ;;  %v1891_v33 = vld [vmem:[#allocation2 + $0x30] sm:$0xff]  }
 0x1b3   : > { %678 = vst [vmem:[#allocation2 + $0x44] sm:$0xf] %v674_v9  ;;  %677 = vst [vmem:[#allocation2 + $0x40] sm:$0xf] %v673_v8  ;;  %v689_v7 = vpop.permute.xlu0 %688  ;;  %v687_v34 = vpop.permute.xlu1 %686  ;;  %1051 = vmatpush1.bf16.msra.mxu0 %v1891_v33  ;;  %1712 = vmatpush1.bf16.msra.mxu1 %v1891_v33 }
 0x1b4   : > { %v690_v35 = vsel %vm360_vm0, %v687_v34, %v689_v7  ;;  %1052 = vmatprep.subr.bf16.mxu0 %v2165_v12  ;;  %1699 = vmatprep.subr.bf16.mxu1 %v2165_v12  ;;  %vm1332_vm0 = vcmask 388416  }
 0x1b5   : > { %v693_v36 = vsel %vm362_vm1, %v679_v32, %v690_v35 }
 0x1b6   : > { %v1630_v37 = vcombine.low %v693_v36, %v693_v36  ;;  %v1631_v38 = vcombine.high %v693_v36, %v693_v36  ;;  %v1892_v39 = vld [vmem:[#allocation2 + $0x38] sm:$0xff]  }
 0x1b7   : > { %v731_v40 = vpop.permute.xlu0 %730  ;;  %v729_v41 = vpop.permute.xlu1 %728  ;;  %1053 = vmatpush1.bf16.msra.mxu0 %v1892_v39  ;;  %1713 = vmatpush1.bf16.msra.mxu1 %v1892_v39 }
 0x1b8   : > { %701 = vst [vmem:[#allocation2 + $0x48] sm:$0xf] %v1630_v37  ;;  %702 = vst [vmem:[#allocation2 + $0x4c] sm:$0xf] %v1631_v38  ;;  %v733_v42 = vrot.slane %v731_v40, 4  ;;  %v732_v43 = vrot.slane %v729_v41, 4  ;;  %1054 = vmatprep.subr.bf16.mxu0 %v2165_v12  ;;  %1700 = vmatprep.subr.bf16.mxu1 %v2165_v12 }
 0x1ba   : > { %v735_v44 = vsel %vm407_vm4, %v731_v40, %v733_v42  ;;  %v734_v45 = vsel %vm407_vm4, %v729_v41, %v732_v43  ;;  %v1893_v46 = vld [vmem:[#allocation2 + $0x40] sm:$0xff]  }
 0x1bb   : > { %739 = vst [vmem:[#allocation2 + $0x54] sm:$0xf] %v735_v44  ;;  %738 = vst [vmem:[#allocation2 + $0x50] sm:$0xf] %v734_v45  ;;  %v768_v47 = vpop.permute.xlu0 %767  ;;  %v766_v48 = vpop.permute.xlu1 %765  ;;  %1055 = vmatpush1.bf16.msra.mxu0 %v1893_v46  ;;  %1714 = vmatpush1.bf16.msra.mxu1 %v1893_v46 }
 0x1bc   : > { %v770_v49 = vrot.slane %v768_v47, 4  ;;  %v769_v50 = vrot.slane %v766_v48, 4  ;;  %1056 = vmatprep.subr.bf16.mxu0 %v2165_v12  ;;  %1701 = vmatprep.subr.bf16.mxu1 %v2165_v12 }
 0x1be   : > { %v772_v51 = vsel %vm445_vm5, %v768_v47, %v770_v49  ;;  %v771_v52 = vsel %vm445_vm5, %v766_v48, %v769_v50 }
 0x1bf   : > { %776 = vst [vmem:[#allocation2 + $0x5c] sm:$0xf] %v772_v51  ;;  %775 = vst [vmem:[#allocation2 + $0x58] sm:$0xf] %v771_v52  ;;  %v805_v53 = vpop.permute.xlu0 %804  ;;  %v803_v54 = vpop.permute.xlu1 %802  ;;  %v1894_v55 = vld [vmem:[#allocation2 + $0x48] sm:$0xff]  }
 0x1c0   : > { %v807_v56 = vrot.slane %v805_v53, 4  ;;  %v806_v57 = vrot.slane %v803_v54, 4  ;;  %1057 = vmatpush1.bf16.msra.mxu0 %v1894_v55  ;;  %1715 = vmatpush1.bf16.msra.mxu1 %v1894_v55 }
 0x1c1   : > { %1058 = vmatprep.subr.bf16.mxu0 %v2165_v12  ;;  %1702 = vmatprep.subr.bf16.mxu1 %v2165_v12 }
 0x1c2   : > { %v809_v58 = vsel %vm483_vm6, %v805_v53, %v807_v56  ;;  %v808_v59 = vsel %vm483_vm6, %v803_v54, %v806_v57  ;;  %v1895_v60 = vld [vmem:[#allocation2 + $0x50] sm:$0xff]  }
 0x1c3   : > { %813 = vst [vmem:[#allocation2 + $0x64] sm:$0xf] %v809_v58  ;;  %812 = vst [vmem:[#allocation2 + $0x60] sm:$0xf] %v808_v59  ;;  %v817_v61 = vpop.permute.xlu1 %816 }
 0x1c4   : > { %v818_v62 = vrot.slane %v817_v61, 4  ;;  %1059 = vmatpush1.bf16.msra.mxu0 %v1895_v60  ;;  %1716 = vmatpush1.bf16.msra.mxu1 %v1895_v60 }
 0x1c5   : > { %1060 = vmatprep.subr.bf16.mxu0 %v2165_v12  ;;  %1703 = vmatprep.subr.bf16.mxu1 %v2165_v12 }
 0x1c6   : > { %v819_v63 = vsel %vm521_vm7, %v817_v61, %v818_v62  ;;  %v1896_v0 = vld [vmem:[#allocation2 + $0x58] sm:$0xff]  }
 0x1c7   : > { %821 = vst [vmem:[#allocation2 + $0x68] sm:$0xf] %v819_v63 }
 0x1c8   : > { %1061 = vmatpush1.bf16.msra.mxu0 %v1896_v0  ;;  %1717 = vmatpush1.bf16.msra.mxu1 %v1896_v0 }
 0x1c9   : > { %1062 = vmatprep.subr.bf16.mxu0 %v2165_v12  ;;  %1704 = vmatprep.subr.bf16.mxu1 %v2165_v12 }
 0x1ca   : > { %v1897_v1 = vld [vmem:[#allocation2 + $0x60] sm:$0xff]  }
 0x1cc   : > { %1063 = vmatpush1.bf16.msra.mxu0 %v1897_v1  ;;  %1718 = vmatpush1.bf16.msra.mxu1 %v1897_v1 }
 0x1cd   : > { %1064 = vmatprep.subr.bf16.mxu0 %v2165_v12  ;;  %1705 = vmatprep.subr.bf16.mxu1 %v2165_v12 }
 0x1ce   : > { %v1898_v2 = vld [vmem:[#allocation2 + $0x68] ss:$0 sps:$4 sm:$0xff]  }
 0x1cf   : > { %v1036_v3 = vsel %vm362_vm1, %v1898_v2, 0  ;;  %vm1365_vm1 = vcmask 454016  }
 0x1d0   : > { %1065 = vmatpush1.bf16.msra.mxu0 %v1036_v3  ;;  %1719 = vmatpush1.bf16.msra.mxu1 %v1036_v3 }
 0x1d2   : > { %v868_v14 = vpop.permute.xlu0 %867 }
 0x1d3   : > { %1071 = vmatmul.mubr.bf16.vlgmr.msra.gmra.mrb[0].mxu0 %v1899_v4  ;;  %1087 = vmatmul.mubr.bf16.vlgmr.msra.gmra.mrb[0].mxu1 %v1902_v10 }
 0x1d4   : > { %1667 = vmatprep.mubr.msk.bf16.mxu0 %vm1022_vm3, %v1905_v6  ;;  %1669 = vmatprep.mubr.msk.bf16.mxu1 %vm1022_vm3, %v1907_v5  ;;  %v873_v15 = vpop.permute.xlu1 %872  ;;  %vm1407_vm3 = vcmask 1043968  }
 0x1d6   : > { %v883_v16 = vpop.permute.xlu0 %882 }
 0x1d8   : > { %v878_v17 = vpop.permute.xlu1 %877 }
 0x1da   : > { %v893_v18 = vpop.permute.xlu0 %892 }
 0x1db   : > { %1079 = vmatmul.mubr.bf16.gmra.mrb[4].mxu0 %v1909_v11  ;;  %1095 = vmatmul.mubr.bf16.gmra.mrb[4].mxu1 %v1910_v13 }
 0x1dc   : > { %v888_v19 = vpop.permute.xlu1 %887 }
 0x1de   : > { %v903_v54 = vpop.permute.xlu0 %902 }
 0x1e0   : > { %v898_v51 = vpop.permute.xlu1 %897 }
 0x2a6   : > { %v1072_v20 = vpop.f32.mrb[0].mxu0  ;;  %v1088_v21 = vpop.f32.mrb[0].mxu1 }
 0x2a7   : > { %v1073_v22 = vadd.f32 %v1072_v20, %v868_v14  ;;  %v1089_v23 = vadd.f32 %v1088_v21, %v888_v19  ;;  %v1074_v24 = vpop.f32.mrb[1].mxu0  ;;  %v1090_v25 = vpop.f32.mrb[1].mxu1 }
 0x2a8   : > { %v1075_v26 = vpop.f32.mrb[2].mxu0  ;;  %v1091_v27 = vpop.f32.mrb[2].mxu1 }
 0x2a9   : > { %v1103_v28 = vmul.f32 0.01, %v1073_v22  ;;  %v1107_v29 = vmul.f32 0.01, %v1089_v23  ;;  %v1076_v30 = vadd.f32 %v1075_v26, %v873_v15  ;;  %v1092_v31 = vadd.f32 %v1091_v27, %v893_v18  ;;  %v1077_v32 = vpop.f32.mrb[3].mxu0  ;;  %v1093_v9 = vpop.f32.mrb[3].mxu1 }
 0x2ab   : > { %v1111_v8 = vmax.f32 %v1073_v22, %v1103_v28  ;;  %v1104_v33 = vmul.f32 0.01, %v1076_v30  ;;  %v1108_v7 = vmul.f32 0.01, %v1092_v31  ;;  %v1115_v35 = vmax.f32 %v1089_v23, %v1107_v29 }
 0x2ad   : > { %v1684_v34 = vpack.c.bf16 %v1111_v8, %v1111_v8  ;;  %v1112_v36 = vmax.f32 %v1076_v30, %v1104_v33  ;;  %v1116_v40 = vmax.f32 %v1092_v31, %v1108_v7  ;;  %v1688_v46 = vpack.c.bf16 %v1115_v35, %v1115_v35 }
 0x2ae   : > { %v1080_v37 = vpop.f32.mrb[4].mxu0  ;;  %v1096_v38 = vpop.f32.mrb[4].mxu1 }
 0x2af   : > { %v1685_v39 = vpack.c.bf16 %v1112_v36, %v1112_v36  ;;  %v1081_v41 = vadd.f32 %v1080_v37, %v878_v17  ;;  %v1082_v42 = vpop.f32.mrb[5].mxu0  ;;  %v1098_v43 = vpop.f32.mrb[5].mxu1  ;;  %1143 = vrot.lane.b32.xlu1 %v1684_v34, %s2167_s12  ;;  %v1689_v50 = vpack.c.bf16 %v1116_v40, %v1116_v40  ;;  %v1097_v53 = vadd.f32 %v1096_v38, %v898_v51 }
 0x2b0   : > { %v1083_v44 = vpop.f32.mrb[6].mxu0  ;;  %v1099_v45 = vpop.f32.mrb[6].mxu1 }
 0x2b1   : > { %v1084_v47 = vadd.f32 %v1083_v44, %v883_v16  ;;  %1145 = vrot.lane.b32.xlu0 %v1685_v39, %s2167_s12  ;;  %v1085_v48 = vpop.f32.mrb[7].mxu0  ;;  %v1101_v49 = vpop.f32.mrb[7].mxu1  ;;  %v1105_v52 = vmul.f32 0.01, %v1081_v41  ;;  %v1100_v56 = vadd.f32 %v1099_v45, %v903_v54  ;;  %v1109_v58 = vmul.f32 0.01, %v1097_v53 }
 0x2b3   : > { %1151 = vrot.lane.b32.xlu1 %v1688_v46, %s2167_s12  ;;  %v1106_v55 = vmul.f32 0.01, %v1084_v47  ;;  %v1113_v57 = vmax.f32 %v1081_v41, %v1105_v52  ;;  %v1110_v60 = vmul.f32 0.01, %v1100_v56  ;;  %v1117_v62 = vmax.f32 %v1097_v53, %v1109_v58 }
 0x2b5   : > { %1153 = vrot.lane.b32.xlu0 %v1689_v50, %s2167_s12  ;;  %v1114_v59 = vmax.f32 %v1084_v47, %v1106_v55  ;;  %v1686_v61 = vpack.c.bf16 %v1113_v57, %v1113_v57  ;;  %v1118_v0 = vmax.f32 %v1100_v56, %v1110_v60  ;;  %v1690_v1 = vpack.c.bf16 %v1117_v62, %v1117_v62 }
 0x2b7   : > { %1176 = vrot.lane.b32.xlu1 %v1684_v34, %s2173_s11  ;;  %v1687_v63 = vpack.c.bf16 %v1114_v59, %v1114_v59  ;;  %v1691_v2 = vpack.c.bf16 %v1118_v0, %v1118_v0 }
 0x2b9   : > { %1178 = vrot.lane.b32.xlu0 %v1685_v39, %s2173_s11 }
 0x2bb   : > { %1184 = vrot.lane.b32.xlu1 %v1688_v46, %s2173_s11 }
 0x2bd   : > { %1186 = vrot.lane.b32.xlu0 %v1689_v50, %s2173_s11 }
 0x2bf   : > { %1209 = vrot.lane.b32.xlu1 %v1684_v34, %s2174_s27 }
 0x2c1   : > { %1211 = vrot.lane.b32.xlu0 %v1685_v39, %s2174_s27 }
 0x2c3   : > { %1217 = vrot.lane.b32.xlu1 %v1688_v46, %s2174_s27 }
 0x2c5   : > { %1219 = vrot.lane.b32.xlu0 %v1689_v50, %s2174_s27 }
 0x2c7   : > { %1242 = vrot.lane.b32.xlu1 %v1684_v34, %s2175_s4 }
 0x2c9   : > { %1244 = vrot.lane.b32.xlu0 %v1685_v39, %s2175_s4 }
 0x2cb   : > { %1250 = vrot.lane.b32.xlu1 %v1688_v46, %s2175_s4 }
 0x2cd   : > { %1252 = vrot.lane.b32.xlu0 %v1689_v50, %s2175_s4 }
 0x2cf   : > { %1275 = vrot.lane.b32.xlu1 %v1684_v34, %s2176_s17 }
 0x2d1   : > { %1277 = vrot.lane.b32.xlu0 %v1685_v39, %s2176_s17 }
 0x2d3   : > { %1283 = vrot.lane.b32.xlu1 %v1688_v46, %s2176_s17 }
 0x2d5   : > { %1285 = vrot.lane.b32.xlu0 %v1689_v50, %s2176_s17 }
 0x2d7   : > { %1308 = vrot.lane.b32.xlu1 %v1684_v34, %s2172_s18 }
 0x2d9   : > { %1310 = vrot.lane.b32.xlu0 %v1685_v39, %s2172_s18 }
 0x2db   : > { %1316 = vrot.lane.b32.xlu1 %v1688_v46, %s2172_s18 }
 0x2dd   : > { %1318 = vrot.lane.b32.xlu0 %v1689_v50, %s2172_s18 }
 0x2df   : > { %1341 = vrot.lane.b32.xlu1 %v1684_v34, %s2177_s30 }
 0x2e1   : > { %1343 = vrot.lane.b32.xlu0 %v1685_v39, %s2177_s30 }
 0x2e3   : > { %1349 = vrot.lane.b32.xlu1 %v1688_v46, %s2177_s30 }
 0x2e5   : > { %1351 = vrot.lane.b32.xlu0 %v1689_v50, %s2177_s30 }
 0x2e7   : > { %1374 = vrot.lane.b32.xlu1 %v1684_v34, %s2178_s7 }
 0x2e9   : > { %1376 = vrot.lane.b32.xlu0 %v1685_v39, %s2178_s7 }
 0x2eb   : > { %1382 = vrot.lane.b32.xlu1 %v1688_v46, %s2178_s7 }
 0x2ed   : > { %1384 = vrot.lane.b32.xlu0 %v1689_v50, %s2178_s7 }
 0x2ef   : > { %1147 = vrot.lane.b32.xlu1 %v1686_v61, %s2167_s12 }
 0x2f1   : > { %1149 = vrot.lane.b32.xlu0 %v1687_v63, %s2167_s12 }
 0x2f3   : > { %1155 = vrot.lane.b32.xlu1 %v1690_v1, %s2167_s12 }
 0x2f5   : > { %1157 = vrot.lane.b32.xlu0 %v1691_v2, %s2167_s12  ;;  %s1590_s12 = sshll.u32 %s2511_s10, 5 }
 0x2f6   : > { %s2838_s15 = scalar_lea.vmem [#allocation9], %s1590_s12 }
 0x2f7   : > { %1180 = vrot.lane.b32.xlu1 %v1686_v61, %s2173_s11 }
 0x2f9   : > { %1182 = vrot.lane.b32.xlu0 %v1687_v63, %s2173_s11 }
 0x2fb   : > { %1188 = vrot.lane.b32.xlu1 %v1690_v1, %s2173_s11 }
 0x2fd   : > { %1190 = vrot.lane.b32.xlu0 %v1691_v2, %s2173_s11  ;;  %s1432_s11 = sshll.u32 %s2838_s15, 4  ;;  %s2998_s11 = int_to_ptr.vmem [resolvable:$true] %s1432_s11 }
 0x2fe   : > { %s2003_s12 = scalar_lea.vmem %s2998_s11, 512 }
 0x2ff   : > { %1213 = vrot.lane.b32.xlu1 %v1686_v61, %s2174_s27  ;;  %p2004_p9 = scmp.ne.s32.totalorder %s2998_s11, %s2003_s12 }
 0x301   : > { %1215 = vrot.lane.b32.xlu0 %v1687_v63, %s2174_s27  ;;  %p2005_p1 = pnand %p2004_p9, %p3150_p12 }
 0x303   : > { %1221 = vrot.lane.b32.xlu1 %v1690_v1, %s2174_s27  ;;  %p2006_p2 = pneg %p2005_p1 }
 0x305   : > { %1223 = vrot.lane.b32.xlu0 %v1691_v2, %s2174_s27 }
 0x307   : > { %1246 = vrot.lane.b32.xlu1 %v1686_v61, %s2175_s4 }
 0x309   : > { %1248 = vrot.lane.b32.xlu0 %v1687_v63, %s2175_s4 }
 0x30b   : > { %1254 = vrot.lane.b32.xlu1 %v1690_v1, %s2175_s4 }
 0x30d   : > { %1256 = vrot.lane.b32.xlu0 %v1691_v2, %s2175_s4 }
 0x30f   : > { %1279 = vrot.lane.b32.xlu1 %v1686_v61, %s2176_s17 }
 0x311   : > { %1281 = vrot.lane.b32.xlu0 %v1687_v63, %s2176_s17 }
 0x313   : > { %1287 = vrot.lane.b32.xlu1 %v1690_v1, %s2176_s17 }
 0x315   : > { %1289 = vrot.lane.b32.xlu0 %v1691_v2, %s2176_s17  ;;  %s3149_s17 = sld [smem:[#allocation25_spill]] }
 0x317   : > { %1312 = vrot.lane.b32.xlu1 %v1686_v61, %s2172_s18 }
 0x319   : > { %1314 = vrot.lane.b32.xlu0 %v1687_v63, %s2172_s18 }
 0x31b   : > { %1320 = vrot.lane.b32.xlu1 %v1690_v1, %s2172_s18 }
 0x31d   : > { %1322 = vrot.lane.b32.xlu0 %v1691_v2, %s2172_s18  ;;  %s3147_s18 = sld [smem:[#allocation15_spill]] }
 0x31f   : > { %1345 = vrot.lane.b32.xlu1 %v1686_v61, %s2177_s30 }
 0x321   : > { %1347 = vrot.lane.b32.xlu0 %v1687_v63, %s2177_s30  ;;  %v1144_v3 = vpop.permute.xlu1 %1143 }
 0x322   : > { %1168 = vst.msk [vmem:[%s2838_s15] sm:$0xf] %vm1167_vm11, %v1144_v3 }
 0x323   : > { %v1146_v4 = vpop.permute.xlu0 %1145  ;;  %1353 = vrot.lane.b32.xlu1 %v1690_v1, %s2177_s30  ;;  %s1679_s22 = sshll.u32 %s3147_s18, 3  ;;  %s2179_s18 = smov [#allocation9]  }
 0x324   : > { %1169 = vst.msk [vmem:[%s2838_s15 + $0x4] sm:$0xf] %vm1167_vm11, %v1146_v4  ;;  %s1429_s3 = sadd.s32 %s1680_s14, %s1679_s22  ;;  %s2007_s28 = sshll.u32 %s2179_s18, 4  ;;  %s2008_s28 = int_to_ptr.vmem [resolvable:$false] %s2007_s28 }
 0x325   : > { %1355 = vrot.lane.b32.xlu0 %v1691_v2, %s2177_s30  ;;  %v1152_v10 = vpop.permute.xlu1 %1151  ;;  %s1681_s16 = sshll.u32 %s1429_s3, 6  ;;  %s2009_s22 = scalar_lea.vmem %s2008_s28, 1024 }
 0x326   : > { %1172 = vst.msk [vmem:[%s2838_s15 + $0x10] sm:$0xf] %vm1167_vm11, %v1152_v10  ;;  %s2996_s30 = scalar_lea.hbm %s3149_s17, %s1681_s16  ;;  %p2010_p4 = scmp.lt.s32.totalorder %s2998_s11, %s2008_s28 }
 0x327   : > { %v1154_v6 = vpop.permute.xlu0 %1153  ;;  %1378 = vrot.lane.b32.xlu1 %v1686_v61, %s2178_s7  ;;  %p2011_p11 = scmp.lt.s32.totalorder %s2009_s22, %s2003_s12 }
 0x328   : > { %1173 = vst.msk [vmem:[%s2838_s15 + $0x14] sm:$0xf] %vm1167_vm11, %v1154_v6 }
 0x329   : > { %1380 = vrot.lane.b32.xlu0 %v1687_v63, %s2178_s7  ;;  %v1177_v5 = vpop.permute.xlu1 %1176  ;;  %p2012_p7 = por %p2011_p11, %p2010_p4 }
 0x32a   : > { %1201 = vst.msk [vmem:[%s2838_s15] sm:$0xf] %vm1200_vm12, %v1177_v5 }
 0x32b   : > { %v1179_v11 = vpop.permute.xlu0 %1178  ;;  %1386 = vrot.lane.b32.xlu1 %v1690_v1, %s2178_s7  ;;  %p2013_p3 = pnand %p2012_p7, %p2006_p2 }
 0x32c   : > { %1202 = vst.msk [vmem:[%s2838_s15 + $0x4] sm:$0xf] %vm1200_vm12, %v1179_v11 }
 0x32d   : > { %1388 = vrot.lane.b32.xlu0 %v1691_v2, %s2178_s7  ;;  %v1185_v13 = vpop.permute.xlu1 %1184  ;;  %s1417_s7 = scalar_lea.sflag [#allocation5], %s2511_s10 }
 0x32e   : > { %1205 = vst.msk [vmem:[%s2838_s15 + $0x10] sm:$0xf] %vm1200_vm12, %v1185_v13 }
 0x32f   : > { %v1187_v14 = vpop.permute.xlu0 %1186 }
 0x330   : > { %1206 = vst.msk [vmem:[%s2838_s15 + $0x14] sm:$0xf] %vm1200_vm12, %v1187_v14 }
 0x331   : > { %v1210_v15 = vpop.permute.xlu1 %1209 }
 0x332   : > { %1234 = vst.msk [vmem:[%s2838_s15] sm:$0xf] %vm1233_vm13, %v1210_v15 }
 0x333   : > { %v1212_v16 = vpop.permute.xlu0 %1211 }
 0x334   : > { %1235 = vst.msk [vmem:[%s2838_s15 + $0x4] sm:$0xf] %vm1233_vm13, %v1212_v16 }
 0x335   : > { %v1218_v17 = vpop.permute.xlu1 %1217 }
 0x336   : > { %1238 = vst.msk [vmem:[%s2838_s15 + $0x10] sm:$0xf] %vm1233_vm13, %v1218_v17 }
 0x337   : > { %v1220_v18 = vpop.permute.xlu0 %1219 }
 0x338   : > { %1239 = vst.msk [vmem:[%s2838_s15 + $0x14] sm:$0xf] %vm1233_vm13, %v1220_v18 }
 0x339   : > { %v1243_v19 = vpop.permute.xlu1 %1242 }
 0x33a   : > { %1267 = vst.msk [vmem:[%s2838_s15] sm:$0xf] %vm1266_vm14, %v1243_v19 }
 0x33b   : > { %v1245_v20 = vpop.permute.xlu0 %1244 }
 0x33c   : > { %1268 = vst.msk [vmem:[%s2838_s15 + $0x4] sm:$0xf] %vm1266_vm14, %v1245_v20 }
 0x33d   : > { %v1251_v21 = vpop.permute.xlu1 %1250 }
 0x33e   : > { %1271 = vst.msk [vmem:[%s2838_s15 + $0x10] sm:$0xf] %vm1266_vm14, %v1251_v21 }
 0x33f   : > { %v1253_v22 = vpop.permute.xlu0 %1252 }
 0x340   : > { %1272 = vst.msk [vmem:[%s2838_s15 + $0x14] sm:$0xf] %vm1266_vm14, %v1253_v22 }
 0x341   : > { %v1276_v23 = vpop.permute.xlu1 %1275 }
 0x342   : > { %1300 = vst.msk [vmem:[%s2838_s15] sm:$0xf] %vm1299_vm15, %v1276_v23 }
 0x343   : > { %v1278_v24 = vpop.permute.xlu0 %1277 }
 0x344   : > { %1301 = vst.msk [vmem:[%s2838_s15 + $0x4] sm:$0xf] %vm1299_vm15, %v1278_v24 }
 0x345   : > { %v1284_v25 = vpop.permute.xlu1 %1283 }
 0x346   : > { %1304 = vst.msk [vmem:[%s2838_s15 + $0x10] sm:$0xf] %vm1299_vm15, %v1284_v25 }
 0x347   : > { %v1286_v26 = vpop.permute.xlu0 %1285 }
 0x348   : > { %1305 = vst.msk [vmem:[%s2838_s15 + $0x14] sm:$0xf] %vm1299_vm15, %v1286_v26 }
 0x349   : > { %v1309_v27 = vpop.permute.xlu1 %1308 }
 0x34a   : > { %1333 = vst.msk [vmem:[%s2838_s15] sm:$0xf] %vm1332_vm0, %v1309_v27 }
 0x34b   : > { %v1311_v28 = vpop.permute.xlu0 %1310 }
 0x34c   : > { %1334 = vst.msk [vmem:[%s2838_s15 + $0x4] sm:$0xf] %vm1332_vm0, %v1311_v28 }
 0x34d   : > { %v1317_v29 = vpop.permute.xlu1 %1316 }
 0x34e   : > { %1337 = vst.msk [vmem:[%s2838_s15 + $0x10] sm:$0xf] %vm1332_vm0, %v1317_v29 }
 0x34f   : > { %v1319_v30 = vpop.permute.xlu0 %1318 }
 0x350   : > { %1338 = vst.msk [vmem:[%s2838_s15 + $0x14] sm:$0xf] %vm1332_vm0, %v1319_v30 }
 0x351   : > { %v1342_v31 = vpop.permute.xlu1 %1341 }
 0x352   : > { %1366 = vst.msk [vmem:[%s2838_s15] sm:$0xf] %vm1365_vm1, %v1342_v31 }
 0x353   : > { %v1344_v32 = vpop.permute.xlu0 %1343 }
 0x354   : > { %1367 = vst.msk [vmem:[%s2838_s15 + $0x4] sm:$0xf] %vm1365_vm1, %v1344_v32 }
 0x355   : > { %v1350_v9 = vpop.permute.xlu1 %1349 }
 0x356   : > { %1370 = vst.msk [vmem:[%s2838_s15 + $0x10] sm:$0xf] %vm1365_vm1, %v1350_v9 }
 0x357   : > { %v1352_v8 = vpop.permute.xlu0 %1351 }
 0x358   : > { %1371 = vst.msk [vmem:[%s2838_s15 + $0x14] sm:$0xf] %vm1365_vm1, %v1352_v8 }
 0x359   : > { %v1375_v33 = vpop.permute.xlu1 %1374 }
 0x35a   : > { %1399 = vst.msk [vmem:[%s2838_s15] sm:$0xf] %vm1398_vm2, %v1375_v33 }
 0x35b   : > { %1408 = vst.msk [vmem:[%s2838_s15] sm:$0xf] %vm1407_vm3, %v2165_v12  ;;  %v1377_v7 = vpop.permute.xlu0 %1376 }
 0x35c   : > { %1400 = vst.msk [vmem:[%s2838_s15 + $0x4] sm:$0xf] %vm1398_vm2, %v1377_v7 }
 0x35d   : > { %1409 = vst.msk [vmem:[%s2838_s15 + $0x4] sm:$0xf] %vm1407_vm3, %v2165_v12  ;;  %v1383_v34 = vpop.permute.xlu1 %1382 }
 0x35e   : > { %1403 = vst.msk [vmem:[%s2838_s15 + $0x10] sm:$0xf] %vm1398_vm2, %v1383_v34 }
 0x35f   : > { %1412 = vst.msk [vmem:[%s2838_s15 + $0x10] sm:$0xf] %vm1407_vm3, %v2165_v12  ;;  %v1385_v35 = vpop.permute.xlu0 %1384 }
 0x360   : > { %1404 = vst.msk [vmem:[%s2838_s15 + $0x14] sm:$0xf] %vm1398_vm2, %v1385_v35 }
 0x361   : > { %1413 = vst.msk [vmem:[%s2838_s15 + $0x14] sm:$0xf] %vm1407_vm3, %v2165_v12  ;;  %v1148_v36 = vpop.permute.xlu1 %1147 }
 0x362   : > { %1170 = vst.msk [vmem:[%s2838_s15 + $0x8] sm:$0xf] %vm1167_vm11, %v1148_v36 }
 0x363   : > { %v1150_v37 = vpop.permute.xlu0 %1149 }
 0x364   : > { %1171 = vst.msk [vmem:[%s2838_s15 + $0xc] sm:$0xf] %vm1167_vm11, %v1150_v37 }
 0x365   : > { %v1156_v38 = vpop.permute.xlu1 %1155 }
 0x366   : > { %1174 = vst.msk [vmem:[%s2838_s15 + $0x18] sm:$0xf] %vm1167_vm11, %v1156_v38 }
 0x367   : > { %v1158_v39 = vpop.permute.xlu0 %1157 }
 0x368   : > { %1175 = vst.msk [vmem:[%s2838_s15 + $0x1c] sm:$0xf] %vm1167_vm11, %v1158_v39 }
 0x369   : > { %v1181_v40 = vpop.permute.xlu1 %1180 }
 0x36a   : > { %1203 = vst.msk [vmem:[%s2838_s15 + $0x8] sm:$0xf] %vm1200_vm12, %v1181_v40 }
 0x36b   : > { %v1183_v41 = vpop.permute.xlu0 %1182 }
 0x36c   : > { %1204 = vst.msk [vmem:[%s2838_s15 + $0xc] sm:$0xf] %vm1200_vm12, %v1183_v41 }
 0x36d   : > { %v1189_v42 = vpop.permute.xlu1 %1188 }
 0x36e   : > { %1207 = vst.msk [vmem:[%s2838_s15 + $0x18] sm:$0xf] %vm1200_vm12, %v1189_v42 }
 0x36f   : > { %v1191_v43 = vpop.permute.xlu0 %1190 }
 0x370   : > { %1208 = vst.msk [vmem:[%s2838_s15 + $0x1c] sm:$0xf] %vm1200_vm12, %v1191_v43 }
 0x371   : > { %v1214_v44 = vpop.permute.xlu1 %1213 }
 0x372   : > { %1236 = vst.msk [vmem:[%s2838_s15 + $0x8] sm:$0xf] %vm1233_vm13, %v1214_v44 }
 0x373   : > { %v1216_v45 = vpop.permute.xlu0 %1215 }
 0x374   : > { %1237 = vst.msk [vmem:[%s2838_s15 + $0xc] sm:$0xf] %vm1233_vm13, %v1216_v45 }
 0x375   : > { %v1222_v46 = vpop.permute.xlu1 %1221 }
 0x376   : > { %1240 = vst.msk [vmem:[%s2838_s15 + $0x18] sm:$0xf] %vm1233_vm13, %v1222_v46 }
 0x377   : > { %v1224_v47 = vpop.permute.xlu0 %1223 }
 0x378   : > { %1241 = vst.msk [vmem:[%s2838_s15 + $0x1c] sm:$0xf] %vm1233_vm13, %v1224_v47 }
 0x379   : > { %v1247_v48 = vpop.permute.xlu1 %1246 }
 0x37a   : > { %1269 = vst.msk [vmem:[%s2838_s15 + $0x8] sm:$0xf] %vm1266_vm14, %v1247_v48 }
 0x37b   : > { %v1249_v49 = vpop.permute.xlu0 %1248 }
 0x37c   : > { %1270 = vst.msk [vmem:[%s2838_s15 + $0xc] sm:$0xf] %vm1266_vm14, %v1249_v49 }
 0x37d   : > { %v1255_v50 = vpop.permute.xlu1 %1254 }
 0x37e   : > { %1273 = vst.msk [vmem:[%s2838_s15 + $0x18] sm:$0xf] %vm1266_vm14, %v1255_v50 }
 0x37f   : > { %v1257_v51 = vpop.permute.xlu0 %1256 }
 0x380   : > { %1274 = vst.msk [vmem:[%s2838_s15 + $0x1c] sm:$0xf] %vm1266_vm14, %v1257_v51 }
 0x381   : > { %v1280_v52 = vpop.permute.xlu1 %1279 }
 0x382   : > { %1302 = vst.msk [vmem:[%s2838_s15 + $0x8] sm:$0xf] %vm1299_vm15, %v1280_v52 }
 0x383   : > { %v1282_v53 = vpop.permute.xlu0 %1281 }
 0x384   : > { %1303 = vst.msk [vmem:[%s2838_s15 + $0xc] sm:$0xf] %vm1299_vm15, %v1282_v53 }
 0x385   : > { %v1288_v54 = vpop.permute.xlu1 %1287 }
 0x386   : > { %1306 = vst.msk [vmem:[%s2838_s15 + $0x18] sm:$0xf] %vm1299_vm15, %v1288_v54 }
 0x387   : > { %v1290_v55 = vpop.permute.xlu0 %1289 }
 0x388   : > { %1307 = vst.msk [vmem:[%s2838_s15 + $0x1c] sm:$0xf] %vm1299_vm15, %v1290_v55 }
 0x389   : > { %v1313_v56 = vpop.permute.xlu1 %1312 }
 0x38a   : > { %1335 = vst.msk [vmem:[%s2838_s15 + $0x8] sm:$0xf] %vm1332_vm0, %v1313_v56 }
 0x38b   : > { %v1315_v57 = vpop.permute.xlu0 %1314 }
 0x38c   : > { %1336 = vst.msk [vmem:[%s2838_s15 + $0xc] sm:$0xf] %vm1332_vm0, %v1315_v57 }
 0x38d   : > { %v1321_v58 = vpop.permute.xlu1 %1320 }
 0x38e   : > { %1339 = vst.msk [vmem:[%s2838_s15 + $0x18] sm:$0xf] %vm1332_vm0, %v1321_v58 }
 0x38f   : > { %v1323_v59 = vpop.permute.xlu0 %1322 }
 0x390   : > { %1340 = vst.msk [vmem:[%s2838_s15 + $0x1c] sm:$0xf] %vm1332_vm0, %v1323_v59 }
 0x391   : > { %v1346_v60 = vpop.permute.xlu1 %1345 }
 0x392   : > { %1368 = vst.msk [vmem:[%s2838_s15 + $0x8] sm:$0xf] %vm1365_vm1, %v1346_v60 }
 0x393   : > { %v1348_v61 = vpop.permute.xlu0 %1347 }
 0x394   : > { %1369 = vst.msk [vmem:[%s2838_s15 + $0xc] sm:$0xf] %vm1365_vm1, %v1348_v61 }
 0x395   : > { %v1354_v62 = vpop.permute.xlu1 %1353 }
 0x396   : > { %1372 = vst.msk [vmem:[%s2838_s15 + $0x18] sm:$0xf] %vm1365_vm1, %v1354_v62 }
 0x397   : > { %v1356_v63 = vpop.permute.xlu0 %1355 }
 0x398   : > { %1373 = vst.msk [vmem:[%s2838_s15 + $0x1c] sm:$0xf] %vm1365_vm1, %v1356_v63 }
 0x399   : > { %v1379_v0 = vpop.permute.xlu1 %1378 }
 0x39a   : > { %1401 = vst.msk [vmem:[%s2838_s15 + $0x8] sm:$0xf] %vm1398_vm2, %v1379_v0 }
 0x39b   : > { %1410 = vst.msk [vmem:[%s2838_s15 + $0x8] sm:$0xf] %vm1407_vm3, %v2165_v12  ;;  %v1381_v1 = vpop.permute.xlu0 %1380 }
 0x39c   : > { %1402 = vst.msk [vmem:[%s2838_s15 + $0xc] sm:$0xf] %vm1398_vm2, %v1381_v1 }
 0x39d   : > { %1411 = vst.msk [vmem:[%s2838_s15 + $0xc] sm:$0xf] %vm1407_vm3, %v2165_v12  ;;  %v1387_v2 = vpop.permute.xlu1 %1386 }
 0x39e   : > { %1405 = vst.msk [vmem:[%s2838_s15 + $0x18] sm:$0xf] %vm1398_vm2, %v1387_v2 }
 0x39f   : > { %1414 = vst.msk [vmem:[%s2838_s15 + $0x18] sm:$0xf] %vm1407_vm3, %v2165_v12  ;;  %v1389_v3 = vpop.permute.xlu0 %1388 }
 0x3a0   : > { %1406 = vst.msk [vmem:[%s2838_s15 + $0x1c] sm:$0xf] %vm1398_vm2, %v1389_v3 }
 0x3a1   : > { %1415 = vst.msk [vmem:[%s2838_s15 + $0x1c] sm:$0xf] %vm1407_vm3, %v2165_v12 }
 0x3a2   : > { %2016 = shalt.err (!%p2013_p3)
}
 0x3a3   : > { %s2017_s15 = scalar_lea.hbm %s2996_s30, 512  ;;  %s2021_s16 = scalar_lea.hbm %s3149_s17, 4096 }
 0x3a4   : > { %p2018_p5 = scmp.ne.s32.totalorder %s2996_s30, %s2017_s15  ;;  %p2022_p6 = scmp.lt.u32.totalorder %s2996_s30, %s3149_s17 }
 0x3a5   : > { %p2023_p13 = scmp.lt.u32.totalorder %s2021_s16, %s2017_s15  ;;  %p2025_p9 = scmp.lt.u32.totalorder %s2017_s15, %s2996_s30 }
 0x3a6   : > { %p2019_p10 = pnand %p2018_p5, %p3150_p12 }
 0x3a7   : > { %p2024_p0 = por %p2023_p13, %p2022_p6 }
 0x3a8   : > { %p2020_p8 = pneg %p2019_p10 }
 0x3a9   : > { %p2026_p1 = por %p2025_p9, %p2024_p0 }
 0x3ab   : > { %p2027_p2 = pnand %p2026_p1, %p2020_p8 }
 0x3ad   : > { %2030 = shalt.err (!%p2027_p2)
}
 0x3ae   : > { %s2180_s12 = smov 64   ;;  %s2181_s18 = smov 4  }
 0x3af   : > { %1727 = dma.vmem_to_hbm [thread:$0]  (%p3150_p12), %s2998_s11, 512, %s2996_s30, %s1417_s7, %s2180_s12, %s2180_s12, %s2181_s18  }
 0x3b0 PF: > { %p1744_p4 = scmp.ge.s32.totalorder %s2157_s6, 2  ;;  %s1447_s28 = sand.u32 1, %s2129_s24  }
 0x3b1   : > { %p3151_p11 = scmp.ne.s32.totalorder %s3131_s8, 0  ;;  %s1448_s22 = scalar_lea.sflag [#allocation5], %s1447_s28 }
 0x3b3   : > { %p1740_p7 = pnand %p1744_p4, %p3151_p11 }
 0x3b5   : > { %2100 = dma.done.wait (!%p1740_p7), %s1448_s22, 512  }
 0x3b6   : > { %2102 = vsyncadd (!%p1740_p7), %s1448_s22, 4294966784  ;;  %s24_s6 = sadd.s32 1, %s2157_s6   ;;  %s3153_s13 = sld [smem:[#allocation14_spill]] }
 0x3b7   : > { %p3037_p3 = scmp.ge.s32.totalorder %s24_s6, 10   ;;  %s3154_s10 = sld [smem:[#allocation21_spill]] }
 0x3b8   : > { %s3155_s11 = smov %s2395_s21  ;;  %s3156_s28 = sld [smem:[#allocation17_spill]] }
 0x3b9   : > { %s3157_s8 = sld [smem:[#allocation18_spill]]  ;;  %s3158_s30 = sld [smem:[#allocation19_spill]] }
 0x3ba   : > { %s3159_s18 = smov %s2109_s19  ;;  %s3160_s19 = smov %s2113_s20 }
 0x3bb   : > { %s3161_s20 = smov %s2462_s9  ;;  %s3163_s22 = smov %s2125_s23 }
 0x3bc   : > { %s3162_s21 = smov %s3153_s13  ;;  %s3165_s24 = smov %s2133_s25 }
 0x3bd   : > { %s3164_s23 = smov %s3154_s10  ;;  %s3166_s25 = smov %s2137_s26 }
 0x3be   : > { %s3167_s26 = smov %s3155_s11  ;;  %s3168_s27 = smov %s2149_s29 }
 0x3bf   : > { %s3169_s29 = smov %s3157_s8  ;;  %23 = sbr.rel (!%p3037_p3) target bundleno = 17 (0x11), region = 109 }
 0x3c6   :  { %1453 = vsyncpa [#allocation4], 1 }
 0x3c7   :  { %1455 = vsyncpa [#allocation4 + $0x1], 1 }
 0x3c8   :  { %1456 = vsyncpa [#allocation7], 1 }
 0x3c9   :  { %1458 = vsyncpa [#allocation7 + $0x1], 1 }
 0x3ca   :  { %1459 = vsyncpa [#allocation5], 1 }
 0x3cb   :  { %1461 = vsyncpa [#allocation5 + $0x1], 1 }

</bundles_post_ra>
